<compile_context>
chip_gen: v7x
topology: tpu7x:2x2x1
jax: 0.10.0
libtpu: 0.0.40
codegen_flags: <defaults>
</compile_context>

<pallas_src>
import functools
import math

import jax
import jax.numpy as jnp
from jax.experimental import pallas as pl
from jax.experimental.pallas import tpu as pltpu


def _round_up(x, m):
    return (x + m - 1) // m * m


# -----------------------------------------------------------------------------
# Pallas kernel: single deep-K matmul (patches @ weight) + folded-BN bias with a
# fused elementwise epilogue.  epilogue in {"none", "relu", "add_relu", "scgate"}.
#   add_relu: out = relu(acc + extras[0])                (conv3 + residual)
#   scgate  : out = acc * sigmoid(extras[0] + extras[1]) (k3 * gate(identity+up(k2)))
# -----------------------------------------------------------------------------
def _conv_mm_kernel(x_ref, w_ref, b_ref, *rest, epilogue):
    o_ref = rest[-1]
    extras = rest[:-1]
    # bf16 x bf16 -> f32 accumulation on the MXU, one matmul with K = 9*Cin.
    acc = jnp.dot(x_ref[...], w_ref[...], preferred_element_type=jnp.float32)
    acc = acc + b_ref[...]                      # (1, Cout) broadcasts over rows
    if epilogue == "relu":
        acc = jnp.maximum(acc, 0.0)
    elif epilogue == "add_relu":
        acc = jnp.maximum(acc + extras[0][...], 0.0)
    elif epilogue == "scgate":
        z = extras[0][...] + extras[1][...]     # identity + nearest-up(k2)
        gate = pl.reciprocal(1.0 + jnp.exp(-z), approx=True)   # EUP exp + vrcp
        acc = acc * gate
    o_ref[...] = acc.astype(o_ref.dtype)


def conv_mm(patches, w, b, *, epilogue="none", extras=(), tm_max=1024):
    """patches: (M, Kc) -> (M, Cout) f32.  w: (Kc, Cout), b: (1, Cout).

    Rows are tiled over a parallel grid; weight/bias blocks stay resident.
    """
    m, kc = patches.shape
    cout = w.shape[-1]
    tm = min(tm_max, _round_up(m, 8))
    m_pad = _round_up(m, tm)

    def _pad_rows(a):
        if a.shape[0] == m_pad:
            return a
        return jnp.pad(a, ((0, m_pad - a.shape[0]), (0, 0)))

    patches_p = _pad_rows(patches).astype(jnp.bfloat16)
    extras_p = [_pad_rows(e).astype(jnp.float32) for e in extras]
    n_ex = len(extras_p)

    flops = 2 * m_pad * kc * cout
    transcendentals = m_pad * cout if epilogue == "scgate" else 0
    bytes_accessed = (m_pad * kc * 2 + kc * cout * 2 + cout * 4
                      + m_pad * cout * 4 * (1 + n_ex))

    in_specs = [
        pl.BlockSpec((tm, kc), lambda i: (i, 0)),      # row tile of patches
        pl.BlockSpec((kc, cout), lambda i: (0, 0)),    # resident weight
        pl.BlockSpec((1, cout), lambda i: (0, 0)),     # resident bias
    ]
    in_specs += [pl.BlockSpec((tm, cout), lambda i: (i, 0)) for _ in range(n_ex)]

    out = pl.pallas_call(
        functools.partial(_conv_mm_kernel, epilogue=epilogue),
        out_shape=jax.ShapeDtypeStruct((m_pad, cout), jnp.float32),
        grid=(m_pad // tm,),
        in_specs=in_specs,
        out_specs=pl.BlockSpec((tm, cout), lambda i: (i, 0)),
        compiler_params=pltpu.CompilerParams(
            dimension_semantics=("parallel",),          # independent row tiles
            vmem_limit_bytes=32 * 1024 * 1024),
        cost_estimate=pl.CostEstimate(
            flops=flops, transcendentals=transcendentals,
            bytes_accessed=bytes_accessed),
    )(patches_p, w.astype(jnp.bfloat16), b.astype(jnp.float32), *extras_p)

    return out[:m] if m_pad != m else out


# -----------------------------------------------------------------------------
# Glue: im2col as a single contiguous bf16 (M, 9*Cin) slab, pool / upsample as
# reshape-mean / repeat (no dense HWxHW matrices).
# -----------------------------------------------------------------------------
def im2col_3x3(x, stride):
    """x: (N,H,W,Cin) f32 -> bf16 patches (N*Ho*Wo, 9*Cin), plus (n, ho, wo)."""
    n, h, w, cin = x.shape
    ho = (h + 2 - 3) // stride + 1
    wo = (w + 2 - 3) // stride + 1
    xp = jnp.pad(x.astype(jnp.bfloat16), ((0, 0), (1, 1), (1, 1), (0, 0)))
    cols = []
    for kh in range(3):
        for kw in range(3):
            cols.append(xp[:, kh:kh + stride * (ho - 1) + 1:stride,
                           kw:kw + stride * (wo - 1) + 1:stride, :])
    patches = jnp.concatenate(cols, axis=-1)            # (N, Ho, Wo, 9*Cin)
    # TODO(synk): patch-slab is built in XLA (single contiguous bf16 array) rather
    # than via in-kernel pl.ds shifted views of the padded input.
    return patches.reshape(n * ho * wo, 9 * cin), (n, ho, wo)


def conv3x3_bn(x, w, b, *, stride, epilogue="none", extras=()):
    """x: (N,H,W,Cin) NHWC, w: (9*Cin, Cout), b: (1, Cout) -> (N,Ho,Wo,Cout)."""
    patches, (n, ho, wo) = im2col_3x3(x, stride)
    cout = w.shape[-1]
    out = conv_mm(patches, w, b, epilogue=epilogue, extras=extras)
    return out.reshape(n, ho, wo, cout)


def avg_pool4(x):
    """AvgPool2d(4,4): (N,H,W,C) -> (N,H/4,W/4,C) via reshape + mean (no matmul)."""
    n, h, w, c = x.shape
    return x.reshape(n, h // 4, 4, w // 4, 4, c).mean(axis=(2, 4))


def upsample4_nearest(x):
    """Nearest F.interpolate back to 4x spatial: repeat each pixel 4x4."""
    return jnp.repeat(jnp.repeat(x, 4, axis=1), 4, axis=2)


# -----------------------------------------------------------------------------
# Parameters: conv weight + inference-mode BN folded into (w, b).
# -----------------------------------------------------------------------------
def init_conv_bn(key, ksize, cin, cout):
    k1, k2, k3, k4, k5 = jax.random.split(key, 5)
    fan_in = ksize * ksize * cin
    w = jax.random.normal(k1, (ksize * ksize, cin, cout), jnp.float32) / math.sqrt(fan_in)
    gamma = jax.random.uniform(k2, (cout,), minval=0.5, maxval=1.5)
    beta = jax.random.normal(k3, (cout,)) * 0.1
    mean = jax.random.normal(k4, (cout,)) * 0.1
    var = jax.random.uniform(k5, (cout,), minval=0.5, maxval=1.5)
    scale = gamma * jax.lax.rsqrt(var + 1e-3)            # BN eps = 0.001
    w_eff = (w * scale[None, None, :]).reshape(ksize * ksize * cin, cout)
    b_eff = (beta - mean * scale)[None, :]
    # Weights are stored bf16 (MXU-native); bias stays f32 for the epilogue.
    return w_eff.astype(jnp.bfloat16), b_eff.astype(jnp.float32)


def init_scnet_params(key, in_channels, out_channels, layer_nums):
    in_filters = [in_channels] + list(out_channels[:-1])
    blocks = []
    for i, n_layers in enumerate(layer_nums):
        key, k_stem = jax.random.split(key)
        stem = init_conv_bn(k_stem, 3, in_filters[i], out_channels[i])
        bottlenecks = []
        for _ in range(n_layers):
            c = out_channels[i]
            gw = c // 4                                  # SCBottleneck.expansion == 4
            key, ka, kb, kc, kd, ke = jax.random.split(key, 6)
            bottlenecks.append(dict(
                conv1_b=init_conv_bn(ka, 1, c, gw),
                k2=init_conv_bn(kb, 3, gw, gw),
                k3=init_conv_bn(kc, 3, gw, gw),
                k4=init_conv_bn(kd, 3, gw, gw),
                conv3=init_conv_bn(ke, 1, gw, c),
            ))
        blocks.append(dict(stem=stem, bottlenecks=bottlenecks))
    return blocks


# -----------------------------------------------------------------------------
# Forward pass (SCConv / SCBottleneck / SCNet)
# -----------------------------------------------------------------------------
def sc_bottleneck(p, x):
    """x: (N, H, W, C) NHWC; stride=1, no downsample (as in SCNet)."""
    n, h, w, c = x.shape
    assert h % 4 == 0 and w % 4 == 0, "pooling_r=4 must divide spatial dims"
    gw = p["conv1_b"][0].shape[-1]
    m = n * h * w
    residual = x.reshape(m, c)

    # conv1_b (1x1) + BN + ReLU (fused)
    out_b = conv_mm(x.reshape(m, c), p["conv1_b"][0], p["conv1_b"][1],
                    epilogue="relu")                              # (M, gw) f32
    out_b_img = out_b.reshape(n, h, w, gw)

    # --- SCConv (pooling_r = 4, stride = 1) ---
    pooled = avg_pool4(out_b_img)                                 # AvgPool2d(4)
    k2y = conv3x3_bn(pooled, p["k2"][0], p["k2"][1], stride=1)    # (N,H/4,W/4,gw)
    up_k2 = upsample4_nearest(k2y).reshape(m, gw)                 # nearest interp

    # k3 (3x3) + BN with fused gate: k3(x) * sigmoid(identity + up(k2(x)))
    fused = conv3x3_bn(out_b_img, p["k3"][0], p["k3"][1], stride=1,
                       epilogue="scgate", extras=(out_b, up_k2))  # (N,H,W,gw)

    # k4 (3x3, stride 1) + BN, bottleneck ReLU fused
    out_b = conv3x3_bn(fused, p["k4"][0], p["k4"][1], stride=1,
                       epilogue="relu")                           # (N,H,W,gw)

    # conv3 (1x1) + BN with fused residual add + ReLU
    # TODO(synk): for small group widths (gw < 128) the intermediate outputs are
    # lane-sparse; a production kernel would pad channel groups to 128 lanes.
    out = conv_mm(out_b.reshape(m, gw), p["conv3"][0], p["conv3"][1],
                  epilogue="add_relu", extras=(residual,))        # (M, C)
    return out.reshape(n, h, w, c)


def scnet_forward(params, x_nchw, layer_strides):
    x = jnp.transpose(x_nchw, (0, 2, 3, 1))  # NCHW -> NHWC for the kernels
    outs = []
    for blk, stride in zip(params, layer_strides):
        x = conv3x3_bn(x, blk["stem"][0], blk["stem"][1], stride=stride,
                       epilogue="relu")
        for bp in blk["bottlenecks"]:
            x = sc_bottleneck(bp, x)
        outs.append(jnp.transpose(x, (0, 3, 1, 2)))  # back to NCHW like PyTorch
    return tuple(outs)


# -----------------------------------------------------------------------------
if __name__ == "__main__":
    # Small config consistent with the module: in_channels=32, out_channels=[32,64],
    # layer_nums=[1,1], layer_strides=[2,2]; input (N, C, H, W) = (2, 32, 16, 16).
    in_channels = 32
    out_channels = (32, 64)
    layer_nums = (1, 1)
    layer_strides = (2, 2)

    x = jax.random.normal(jax.random.PRNGKey(0), (2, in_channels, 16, 16), jnp.float32)
    params = init_scnet_params(jax.random.PRNGKey(1), in_channels, out_channels, layer_nums)

    fwd = jax.jit(functools.partial(scnet_forward, layer_strides=layer_strides))
    outs = jax.block_until_ready(fwd(params, x))

    assert outs[0].shape == (2, 32, 8, 8)
    assert outs[1].shape == (2, 64, 4, 4)
    assert all(bool(jnp.all(jnp.isfinite(o))) for o in outs)
    # TODO(synk): BatchNorm is implemented in inference mode with folded synthetic
    # running stats; training-mode batch statistics are not reproduced.
    print("KERNEL_OK")
</pallas_src>

<mosaic_0001>
module attributes {stable_mosaic.version = 11 : i64} {
  func.func @_conv_mm_kernel(%arg0: i32, %arg1: memref<128x288xbf16, #tpu.memory_space<vmem>>, %arg2: memref<288x32xbf16, #tpu.memory_space<vmem>>, %arg3: memref<1x32xf32, #tpu.memory_space<vmem>>, %arg4: memref<128x32xf32, #tpu.memory_space<vmem>>) attributes {dimension_semantics = [#tpu.dimension_semantics<parallel>], iteration_bounds = array<i64: 1>, scalar_prefetch = 0 : i64, scratch_operands = 0 : i64, tpu.core_type = #tpu.core_type<tc>, window_params = [{transform_indices = @transform_0, window_bounds = array<i64: 128, 288>}, {pipeline_mode = #tpu.pipeline_mode<synchronous>, transform_indices = @transform_1, window_bounds = array<i64: 288, 32>}, {pipeline_mode = #tpu.pipeline_mode<synchronous>, transform_indices = @transform_2, window_bounds = array<i64: 1, 32>}, {transform_indices = @transform_3, window_bounds = array<i64: 128, 32>}]} {
    %c0 = arith.constant 0 : index
    %c0_0 = arith.constant 0 : index
    %0 = vector.load %arg1[%c0, %c0_0] : memref<128x288xbf16, #tpu.memory_space<vmem>>, vector<128x288xbf16>
    %c0_1 = arith.constant 0 : index
    %c0_2 = arith.constant 0 : index
    %1 = vector.load %arg2[%c0_1, %c0_2] : memref<288x32xbf16, #tpu.memory_space<vmem>>, vector<288x32xbf16>
    %cst = arith.constant dense<0.000000e+00> : vector<128x32xf32>
    %2 = tpu.matmul %0, %1, %cst {dimension_numbers = #tpu.dot_dimension_numbers<[1], [0], [0], [1], [0, 0, 1, 1], [], []>} : vector<128x288xbf16>, vector<288x32xbf16>, vector<128x32xf32> -> vector<128x32xf32>
    %c0_3 = arith.constant 0 : index
    %c0_4 = arith.constant 0 : index
    %3 = vector.load %arg3[%c0_3, %c0_4] : memref<1x32xf32, #tpu.memory_space<vmem>>, vector<1x32xf32>
    %4 = vector.broadcast %3 : vector<1x32xf32> to vector<128x32xf32>
    %5 = arith.addf %2, %4 : vector<128x32xf32>
    %cst_5 = arith.constant 0.000000e+00 : f32
    %6 = vector.broadcast %cst_5 : f32 to vector<128x32xf32>
    %7 = arith.maximumf %5, %6 : vector<128x32xf32>
    %c0_6 = arith.constant 0 : index
    %c0_7 = arith.constant 0 : index
    %8 = vector.load %arg4[%c0_6, %c0_7] : memref<128x32xf32, #tpu.memory_space<vmem>>, vector<128x32xf32>
    tpu.vector_store %arg4[%c0_6, %c0_7], %7 {strides = array<i32>} : memref<128x32xf32, #tpu.memory_space<vmem>>, vector<128x32xf32>,
    return
  }
  func.func @transform_0(%arg0: i32) -> (i32, i32) {
    %c0_i32 = arith.constant 0 : i32
    %c0_i32_0 = arith.constant 0 : i32
    return %arg0, %c0_i32 : i32, i32
  }
  func.func @transform_1(%arg0: i32) -> (i32, i32) {
    %c0_i32 = arith.constant 0 : i32
    %c0_i32_0 = arith.constant 0 : i32
    %c0_i32_1 = arith.constant 0 : i32
    return %c0_i32, %c0_i32_0 : i32, i32
  }
  func.func @transform_2(%arg0: i32) -> (i32, i32) {
    %c0_i32 = arith.constant 0 : i32
    %c0_i32_0 = arith.constant 0 : i32
    %c0_i32_1 = arith.constant 0 : i32
    return %c0_i32, %c0_i32_0 : i32, i32
  }
  func.func @transform_3(%arg0: i32) -> (i32, i32) {
    %c0_i32 = arith.constant 0 : i32
    %c0_i32_0 = arith.constant 0 : i32
    return %arg0, %c0_i32 : i32, i32
  }
}

module attributes {stable_mosaic.version = 11 : i64} {
  func.func @_conv_mm_kernel(%arg0: i32, %arg1: memref<128x32xbf16, #tpu.memory_space<vmem>>, %arg2: memref<32x8xbf16, #tpu.memory_space<vmem>>, %arg3: memref<1x8xf32, #tpu.memory_space<vmem>>, %arg4: memref<128x8xf32, #tpu.memory_space<vmem>>) attributes {dimension_semantics = [#tpu.dimension_semantics<parallel>], iteration_bounds = array<i64: 1>, scalar_prefetch = 0 : i64, scratch_operands = 0 : i64, tpu.core_type = #tpu.core_type<tc>, window_params = [{transform_indices = @transform_0, window_bounds = array<i64: 128, 32>}, {pipeline_mode = #tpu.pipeline_mode<synchronous>, transform_indices = @transform_1, window_bounds = array<i64: 32, 8>}, {pipeline_mode = #tpu.pipeline_mode<synchronous>, transform_indices = @transform_2, window_bounds = array<i64: 1, 8>}, {transform_indices = @transform_3, window_bounds = array<i64: 128, 8>}]} {
    %c0 = arith.constant 0 : index
    %c0_0 = arith.constant 0 : index
    %0 = vector.load %arg1[%c0, %c0_0] : memref<128x32xbf16, #tpu.memory_space<vmem>>, vector<128x32xbf16>
    %c0_1 = arith.constant 0 : index
    %c0_2 = arith.constant 0 : index
    %1 = vector.load %arg2[%c0_1, %c0_2] : memref<32x8xbf16, #tpu.memory_space<vmem>>, vector<32x8xbf16>
    %cst = arith.constant dense<0.000000e+00> : vector<128x8xf32>
    %2 = tpu.matmul %0, %1, %cst {dimension_numbers = #tpu.dot_dimension_numbers<[1], [0], [0], [1], [0, 0, 1, 1], [], []>} : vector<128x32xbf16>, vector<32x8xbf16>, vector<128x8xf32> -> vector<128x8xf32>
    %c0_3 = arith.constant 0 : index
    %c0_4 = arith.constant 0 : index
    %3 = vector.load %arg3[%c0_3, %c0_4] : memref<1x8xf32, #tpu.memory_space<vmem>>, vector<1x8xf32>
    %4 = vector.broadcast %3 : vector<1x8xf32> to vector<128x8xf32>
    %5 = arith.addf %2, %4 : vector<128x8xf32>
    %cst_5 = arith.constant 0.000000e+00 : f32
    %6 = vector.broadcast %cst_5 : f32 to vector<128x8xf32>
    %7 = arith.maximumf %5, %6 : vector<128x8xf32>
    %c0_6 = arith.constant 0 : index
    %c0_7 = arith.constant 0 : index
    %8 = vector.load %arg4[%c0_6, %c0_7] : memref<128x8xf32, #tpu.memory_space<vmem>>, vector<128x8xf32>
    tpu.vector_store %arg4[%c0_6, %c0_7], %7 {strides = array<i32>} : memref<128x8xf32, #tpu.memory_space<vmem>>, vector<128x8xf32>,
    return
  }
  func.func @transform_0(%arg0: i32) -> (i32, i32) {
    %c0_i32 = arith.constant 0 : i32
    %c0_i32_0 = arith.constant 0 : i32
    return %arg0, %c0_i32 : i32, i32
  }
  func.func @transform_1(%arg0: i32) -> (i32, i32) {
    %c0_i32 = arith.constant 0 : i32
    %c0_i32_0 = arith.constant 0 : i32
    %c0_i32_1 = arith.constant 0 : i32
    return %c0_i32, %c0_i32_0 : i32, i32
  }
  func.func @transform_2(%arg0: i32) -> (i32, i32) {
    %c0_i32 = arith.constant 0 : i32
    %c0_i32_0 = arith.constant 0 : i32
    %c0_i32_1 = arith.constant 0 : i32
    return %c0_i32, %c0_i32_0 : i32, i32
  }
  func.func @transform_3(%arg0: i32) -> (i32, i32) {
    %c0_i32 = arith.constant 0 : i32
    %c0_i32_0 = arith.constant 0 : i32
    return %arg0, %c0_i32 : i32, i32
  }
}

module attributes {stable_mosaic.version = 11 : i64} {
  func.func @_conv_mm_kernel(%arg0: i32, %arg1: memref<8x72xbf16, #tpu.memory_space<vmem>>, %arg2: memref<72x8xbf16, #tpu.memory_space<vmem>>, %arg3: memref<1x8xf32, #tpu.memory_space<vmem>>, %arg4: memref<8x8xf32, #tpu.memory_space<vmem>>) attributes {dimension_semantics = [#tpu.dimension_semantics<parallel>], iteration_bounds = array<i64: 1>, scalar_prefetch = 0 : i64, scratch_operands = 0 : i64, tpu.core_type = #tpu.core_type<tc>, window_params = [{transform_indices = @transform_0, window_bounds = array<i64: 8, 72>}, {pipeline_mode = #tpu.pipeline_mode<synchronous>, transform_indices = @transform_1, window_bounds = array<i64: 72, 8>}, {pipeline_mode = #tpu.pipeline_mode<synchronous>, transform_indices = @transform_2, window_bounds = array<i64: 1, 8>}, {transform_indices = @transform_3, window_bounds = array<i64: 8, 8>}]} {
    %c0 = arith.constant 0 : index
    %c0_0 = arith.constant 0 : index
    %0 = vector.load %arg1[%c0, %c0_0] : memref<8x72xbf16, #tpu.memory_space<vmem>>, vector<8x72xbf16>
    %c0_1 = arith.constant 0 : index
    %c0_2 = arith.constant 0 : index
    %1 = vector.load %arg2[%c0_1, %c0_2] : memref<72x8xbf16, #tpu.memory_space<vmem>>, vector<72x8xbf16>
    %cst = arith.constant dense<0.000000e+00> : vector<8x8xf32>
    %2 = tpu.matmul %0, %1, %cst {dimension_numbers = #tpu.dot_dimension_numbers<[1], [0], [0], [1], [0, 0, 1, 1], [], []>} : vector<8x72xbf16>, vector<72x8xbf16>, vector<8x8xf32> -> vector<8x8xf32>
    %c0_3 = arith.constant 0 : index
    %c0_4 = arith.constant 0 : index
    %3 = vector.load %arg3[%c0_3, %c0_4] : memref<1x8xf32, #tpu.memory_space<vmem>>, vector<1x8xf32>
    %4 = vector.broadcast %3 : vector<1x8xf32> to vector<8x8xf32>
    %5 = arith.addf %2, %4 : vector<8x8xf32>
    %c0_5 = arith.constant 0 : index
    %c0_6 = arith.constant 0 : index
    %6 = vector.load %arg4[%c0_5, %c0_6] : memref<8x8xf32, #tpu.memory_space<vmem>>, vector<8x8xf32>
    tpu.vector_store %arg4[%c0_5, %c0_6], %5 {strides = array<i32>} : memref<8x8xf32, #tpu.memory_space<vmem>>, vector<8x8xf32>,
    return
  }
  func.func @transform_0(%arg0: i32) -> (i32, i32) {
    %c0_i32 = arith.constant 0 : i32
    %c0_i32_0 = arith.constant 0 : i32
    return %arg0, %c0_i32 : i32, i32
  }
  func.func @transform_1(%arg0: i32) -> (i32, i32) {
    %c0_i32 = arith.constant 0 : i32
    %c0_i32_0 = arith.constant 0 : i32
    %c0_i32_1 = arith.constant 0 : i32
    return %c0_i32, %c0_i32_0 : i32, i32
  }
  func.func @transform_2(%arg0: i32) -> (i32, i32) {
    %c0_i32 = arith.constant 0 : i32
    %c0_i32_0 = arith.constant 0 : i32
    %c0_i32_1 = arith.constant 0 : i32
    return %c0_i32, %c0_i32_0 : i32, i32
  }
  func.func @transform_3(%arg0: i32) -> (i32, i32) {
    %c0_i32 = arith.constant 0 : i32
    %c0_i32_0 = arith.constant 0 : i32
    return %arg0, %c0_i32 : i32, i32
  }
}

module attributes {stable_mosaic.version = 11 : i64} {
  func.func @_conv_mm_kernel(%arg0: i32, %arg1: memref<128x72xbf16, #tpu.memory_space<vmem>>, %arg2: memref<72x8xbf16, #tpu.memory_space<vmem>>, %arg3: memref<1x8xf32, #tpu.memory_space<vmem>>, %arg4: memref<128x8xf32, #tpu.memory_space<vmem>>, %arg5: memref<128x8xf32, #tpu.memory_space<vmem>>, %arg6: memref<128x8xf32, #tpu.memory_space<vmem>>) attributes {dimension_semantics = [#tpu.dimension_semantics<parallel>], iteration_bounds = array<i64: 1>, scalar_prefetch = 0 : i64, scratch_operands = 0 : i64, tpu.core_type = #tpu.core_type<tc>, window_params = [{transform_indices = @transform_0, window_bounds = array<i64: 128, 72>}, {pipeline_mode = #tpu.pipeline_mode<synchronous>, transform_indices = @transform_1, window_bounds = array<i64: 72, 8>}, {pipeline_mode = #tpu.pipeline_mode<synchronous>, transform_indices = @transform_2, window_bounds = array<i64: 1, 8>}, {transform_indices = @transform_3, window_bounds = array<i64: 128, 8>}, {transform_indices = @transform_4, window_bounds = array<i64: 128, 8>}, {transform_indices = @transform_5, window_bounds = array<i64: 128, 8>}]} {
    %c0 = arith.constant 0 : index
    %c0_0 = arith.constant 0 : index
    %0 = vector.load %arg1[%c0, %c0_0] : memref<128x72xbf16, #tpu.memory_space<vmem>>, vector<128x72xbf16>
    %c0_1 = arith.constant 0 : index
    %c0_2 = arith.constant 0 : index
    %1 = vector.load %arg2[%c0_1, %c0_2] : memref<72x8xbf16, #tpu.memory_space<vmem>>, vector<72x8xbf16>
    %cst = arith.constant dense<0.000000e+00> : vector<128x8xf32>
    %2 = tpu.matmul %0, %1, %cst {dimension_numbers = #tpu.dot_dimension_numbers<[1], [0], [0], [1], [0, 0, 1, 1], [], []>} : vector<128x72xbf16>, vector<72x8xbf16>, vector<128x8xf32> -> vector<128x8xf32>
    %c0_3 = arith.constant 0 : index
    %c0_4 = arith.constant 0 : index
    %3 = vector.load %arg3[%c0_3, %c0_4] : memref<1x8xf32, #tpu.memory_space<vmem>>, vector<1x8xf32>
    %4 = vector.broadcast %3 : vector<1x8xf32> to vector<128x8xf32>
    %5 = arith.addf %2, %4 : vector<128x8xf32>
    %c0_5 = arith.constant 0 : index
    %c0_6 = arith.constant 0 : index
    %6 = vector.load %arg4[%c0_5, %c0_6] : memref<128x8xf32, #tpu.memory_space<vmem>>, vector<128x8xf32>
    %c0_7 = arith.constant 0 : index
    %c0_8 = arith.constant 0 : index
    %7 = vector.load %arg5[%c0_7, %c0_8] : memref<128x8xf32, #tpu.memory_space<vmem>>, vector<128x8xf32>
    %8 = arith.addf %6, %7 : vector<128x8xf32>
    %cst_9 = arith.constant 0.000000e+00 : f32
    %9 = vector.broadcast %cst_9 : f32 to vector<128x8xf32>
    %10 = arith.subf %9, %8 : vector<128x8xf32>
    %11 = math.exp %10 : vector<128x8xf32>
    %cst_10 = arith.constant 1.000000e+00 : f32
    %12 = vector.broadcast %cst_10 : f32 to vector<128x8xf32>
    %13 = arith.addf %12, %11 : vector<128x8xf32>
    %14 = tpu.reciprocal %13 {approx = true} : vector<128x8xf32> -> vector<128x8xf32>
    %15 = arith.mulf %5, %14 : vector<128x8xf32>
    %c0_11 = arith.constant 0 : index
    %c0_12 = arith.constant 0 : index
    %16 = vector.load %arg6[%c0_11, %c0_12] : memref<128x8xf32, #tpu.memory_space<vmem>>, vector<128x8xf32>
    tpu.vector_store %arg6[%c0_11, %c0_12], %15 {strides = array<i32>} : memref<128x8xf32, #tpu.memory_space<vmem>>, vector<128x8xf32>,
    return
  }
  func.func @transform_0(%arg0: i32) -> (i32, i32) {
    %c0_i32 = arith.constant 0 : i32
    %c0_i32_0 = arith.constant 0 : i32
    return %arg0, %c0_i32 : i32, i32
  }
  func.func @transform_1(%arg0: i32) -> (i32, i32) {
    %c0_i32 = arith.constant 0 : i32
    %c0_i32_0 = arith.constant 0 : i32
    %c0_i32_1 = arith.constant 0 : i32
    return %c0_i32, %c0_i32_0 : i32, i32
  }
  func.func @transform_2(%arg0: i32) -> (i32, i32) {
    %c0_i32 = arith.constant 0 : i32
    %c0_i32_0 = arith.constant 0 : i32
    %c0_i32_1 = arith.constant 0 : i32
    return %c0_i32, %c0_i32_0 : i32, i32
  }
  func.func @transform_3(%arg0: i32) -> (i32, i32) {
    %c0_i32 = arith.constant 0 : i32
    %c0_i32_0 = arith.constant 0 : i32
    return %arg0, %c0_i32 : i32, i32
  }
  func.func @transform_4(%arg0: i32) -> (i32, i32) {
    %c0_i32 = arith.constant 0 : i32
    %c0_i32_0 = arith.constant 0 : i32
    return %arg0, %c0_i32 : i32, i32
  }
  func.func @transform_5(%arg0: i32) -> (i32, i32) {
    %c0_i32 = arith.constant 0 : i32
    %c0_i32_0 = arith.constant 0 : i32
    return %arg0, %c0_i32 : i32, i32
  }
}

module attributes {stable_mosaic.version = 11 : i64} {
  func.func @_conv_mm_kernel(%arg0: i32, %arg1: memref<128x72xbf16, #tpu.memory_space<vmem>>, %arg2: memref<72x8xbf16, #tpu.memory_space<vmem>>, %arg3: memref<1x8xf32, #tpu.memory_space<vmem>>, %arg4: memref<128x8xf32, #tpu.memory_space<vmem>>) attributes {dimension_semantics = [#tpu.dimension_semantics<parallel>], iteration_bounds = array<i64: 1>, scalar_prefetch = 0 : i64, scratch_operands = 0 : i64, tpu.core_type = #tpu.core_type<tc>, window_params = [{transform_indices = @transform_0, window_bounds = array<i64: 128, 72>}, {pipeline_mode = #tpu.pipeline_mode<synchronous>, transform_indices = @transform_1, window_bounds = array<i64: 72, 8>}, {pipeline_mode = #tpu.pipeline_mode<synchronous>, transform_indices = @transform_2, window_bounds = array<i64: 1, 8>}, {transform_indices = @transform_3, window_bounds = array<i64: 128, 8>}]} {
    %c0 = arith.constant 0 : index
    %c0_0 = arith.constant 0 : index
    %0 = vector.load %arg1[%c0, %c0_0] : memref<128x72xbf16, #tpu.memory_space<vmem>>, vector<128x72xbf16>
    %c0_1 = arith.constant 0 : index
    %c0_2 = arith.constant 0 : index
    %1 = vector.load %arg2[%c0_1, %c0_2] : memref<72x8xbf16, #tpu.memory_space<vmem>>, vector<72x8xbf16>
    %cst = arith.constant dense<0.000000e+00> : vector<128x8xf32>
    %2 = tpu.matmul %0, %1, %cst {dimension_numbers = #tpu.dot_dimension_numbers<[1], [0], [0], [1], [0, 0, 1, 1], [], []>} : vector<128x72xbf16>, vector<72x8xbf16>, vector<128x8xf32> -> vector<128x8xf32>
    %c0_3 = arith.constant 0 : index
    %c0_4 = arith.constant 0 : index
    %3 = vector.load %arg3[%c0_3, %c0_4] : memref<1x8xf32, #tpu.memory_space<vmem>>, vector<1x8xf32>
    %4 = vector.broadcast %3 : vector<1x8xf32> to vector<128x8xf32>
    %5 = arith.addf %2, %4 : vector<128x8xf32>
    %cst_5 = arith.constant 0.000000e+00 : f32
    %6 = vector.broadcast %cst_5 : f32 to vector<128x8xf32>
    %7 = arith.maximumf %5, %6 : vector<128x8xf32>
    %c0_6 = arith.constant 0 : index
    %c0_7 = arith.constant 0 : index
    %8 = vector.load %arg4[%c0_6, %c0_7] : memref<128x8xf32, #tpu.memory_space<vmem>>, vector<128x8xf32>
    tpu.vector_store %arg4[%c0_6, %c0_7], %7 {strides = array<i32>} : memref<128x8xf32, #tpu.memory_space<vmem>>, vector<128x8xf32>,
    return
  }
  func.func @transform_0(%arg0: i32) -> (i32, i32) {
    %c0_i32 = arith.constant 0 : i32
    %c0_i32_0 = arith.constant 0 : i32
    return %arg0, %c0_i32 : i32, i32
  }
  func.func @transform_1(%arg0: i32) -> (i32, i32) {
    %c0_i32 = arith.constant 0 : i32
    %c0_i32_0 = arith.constant 0 : i32
    %c0_i32_1 = arith.constant 0 : i32
    return %c0_i32, %c0_i32_0 : i32, i32
  }
  func.func @transform_2(%arg0: i32) -> (i32, i32) {
    %c0_i32 = arith.constant 0 : i32
    %c0_i32_0 = arith.constant 0 : i32
    %c0_i32_1 = arith.constant 0 : i32
    return %c0_i32, %c0_i32_0 : i32, i32
  }
  func.func @transform_3(%arg0: i32) -> (i32, i32) {
    %c0_i32 = arith.constant 0 : i32
    %c0_i32_0 = arith.constant 0 : i32
    return %arg0, %c0_i32 : i32, i32
  }
}

module attributes {stable_mosaic.version = 11 : i64} {
  func.func @_conv_mm_kernel(%arg0: i32, %arg1: memref<128x8xbf16, #tpu.memory_space<vmem>>, %arg2: memref<8x32xbf16, #tpu.memory_space<vmem>>, %arg3: memref<1x32xf32, #tpu.memory_space<vmem>>, %arg4: memref<128x32xf32, #tpu.memory_space<vmem>>, %arg5: memref<128x32xf32, #tpu.memory_space<vmem>>) attributes {dimension_semantics = [#tpu.dimension_semantics<parallel>], iteration_bounds = array<i64: 1>, scalar_prefetch = 0 : i64, scratch_operands = 0 : i64, tpu.core_type = #tpu.core_type<tc>, window_params = [{transform_indices = @transform_0, window_bounds = array<i64: 128, 8>}, {pipeline_mode = #tpu.pipeline_mode<synchronous>, transform_indices = @transform_1, window_bounds = array<i64: 8, 32>}, {pipeline_mode = #tpu.pipeline_mode<synchronous>, transform_indices = @transform_2, window_bounds = array<i64: 1, 32>}, {transform_indices = @transform_3, window_bounds = array<i64: 128, 32>}, {transform_indices = @transform_4, window_bounds = array<i64: 128, 32>}]} {
    %c0 = arith.constant 0 : index
    %c0_0 = arith.constant 0 : index
    %0 = vector.load %arg1[%c0, %c0_0] : memref<128x8xbf16, #tpu.memory_space<vmem>>, vector<128x8xbf16>
    %c0_1 = arith.constant 0 : index
    %c0_2 = arith.constant 0 : index
    %1 = vector.load %arg2[%c0_1, %c0_2] : memref<8x32xbf16, #tpu.memory_space<vmem>>, vector<8x32xbf16>
    %cst = arith.constant dense<0.000000e+00> : vector<128x32xf32>
    %2 = tpu.matmul %0, %1, %cst {dimension_numbers = #tpu.dot_dimension_numbers<[1], [0], [0], [1], [0, 0, 1, 1], [], []>} : vector<128x8xbf16>, vector<8x32xbf16>, vector<128x32xf32> -> vector<128x32xf32>
    %c0_3 = arith.constant 0 : index
    %c0_4 = arith.constant 0 : index
    %3 = vector.load %arg3[%c0_3, %c0_4] : memref<1x32xf32, #tpu.memory_space<vmem>>, vector<1x32xf32>
    %4 = vector.broadcast %3 : vector<1x32xf32> to vector<128x32xf32>
    %5 = arith.addf %2, %4 : vector<128x32xf32>
    %c0_5 = arith.constant 0 : index
    %c0_6 = arith.constant 0 : index
    %6 = vector.load %arg4[%c0_5, %c0_6] : memref<128x32xf32, #tpu.memory_space<vmem>>, vector<128x32xf32>
    %7 = arith.addf %5, %6 : vector<128x32xf32>
    %cst_7 = arith.constant 0.000000e+00 : f32
    %8 = vector.broadcast %cst_7 : f32 to vector<128x32xf32>
    %9 = arith.maximumf %7, %8 : vector<128x32xf32>
    %c0_8 = arith.constant 0 : index
    %c0_9 = arith.constant 0 : index
    %10 = vector.load %arg5[%c0_8, %c0_9] : memref<128x32xf32, #tpu.memory_space<vmem>>, vector<128x32xf32>
    tpu.vector_store %arg5[%c0_8, %c0_9], %9 {strides = array<i32>} : memref<128x32xf32, #tpu.memory_space<vmem>>, vector<128x32xf32>,
    return
  }
  func.func @transform_0(%arg0: i32) -> (i32, i32) {
    %c0_i32 = arith.constant 0 : i32
    %c0_i32_0 = arith.constant 0 : i32
    return %arg0, %c0_i32 : i32, i32
  }
  func.func @transform_1(%arg0: i32) -> (i32, i32) {
    %c0_i32 = arith.constant 0 : i32
    %c0_i32_0 = arith.constant 0 : i32
    %c0_i32_1 = arith.constant 0 : i32
    return %c0_i32, %c0_i32_0 : i32, i32
  }
  func.func @transform_2(%arg0: i32) -> (i32, i32) {
    %c0_i32 = arith.constant 0 : i32
    %c0_i32_0 = arith.constant 0 : i32
    %c0_i32_1 = arith.constant 0 : i32
    return %c0_i32, %c0_i32_0 : i32, i32
  }
  func.func @transform_3(%arg0: i32) -> (i32, i32) {
    %c0_i32 = arith.constant 0 : i32
    %c0_i32_0 = arith.constant 0 : i32
    return %arg0, %c0_i32 : i32, i32
  }
  func.func @transform_4(%arg0: i32) -> (i32, i32) {
    %c0_i32 = arith.constant 0 : i32
    %c0_i32_0 = arith.constant 0 : i32
    return %arg0, %c0_i32 : i32, i32
  }
}

module attributes {stable_mosaic.version = 11 : i64} {
  func.func @_conv_mm_kernel(%arg0: i32, %arg1: memref<32x288xbf16, #tpu.memory_space<vmem>>, %arg2: memref<288x64xbf16, #tpu.memory_space<vmem>>, %arg3: memref<1x64xf32, #tpu.memory_space<vmem>>, %arg4: memref<32x64xf32, #tpu.memory_space<vmem>>) attributes {dimension_semantics = [#tpu.dimension_semantics<parallel>], iteration_bounds = array<i64: 1>, scalar_prefetch = 0 : i64, scratch_operands = 0 : i64, tpu.core_type = #tpu.core_type<tc>, window_params = [{transform_indices = @transform_0, window_bounds = array<i64: 32, 288>}, {pipeline_mode = #tpu.pipeline_mode<synchronous>, transform_indices = @transform_1, window_bounds = array<i64: 288, 64>}, {pipeline_mode = #tpu.pipeline_mode<synchronous>, transform_indices = @transform_2, window_bounds = array<i64: 1, 64>}, {transform_indices = @transform_3, window_bounds = array<i64: 32, 64>}]} {
    %c0 = arith.constant 0 : index
    %c0_0 = arith.constant 0 : index
    %0 = vector.load %arg1[%c0, %c0_0] : memref<32x288xbf16, #tpu.memory_space<vmem>>, vector<32x288xbf16>
    %c0_1 = arith.constant 0 : index
    %c0_2 = arith.constant 0 : index
    %1 = vector.load %arg2[%c0_1, %c0_2] : memref<288x64xbf16, #tpu.memory_space<vmem>>, vector<288x64xbf16>
    %cst = arith.constant dense<0.000000e+00> : vector<32x64xf32>
    %2 = tpu.matmul %0, %1, %cst {dimension_numbers = #tpu.dot_dimension_numbers<[1], [0], [0], [1], [0, 0, 1, 1], [], []>} : vector<32x288xbf16>, vector<288x64xbf16>, vector<32x64xf32> -> vector<32x64xf32>
    %c0_3 = arith.constant 0 : index
    %c0_4 = arith.constant 0 : index
    %3 = vector.load %arg3[%c0_3, %c0_4] : memref<1x64xf32, #tpu.memory_space<vmem>>, vector<1x64xf32>
    %4 = vector.broadcast %3 : vector<1x64xf32> to vector<32x64xf32>
    %5 = arith.addf %2, %4 : vector<32x64xf32>
    %cst_5 = arith.constant 0.000000e+00 : f32
    %6 = vector.broadcast %cst_5 : f32 to vector<32x64xf32>
    %7 = arith.maximumf %5, %6 : vector<32x64xf32>
    %c0_6 = arith.constant 0 : index
    %c0_7 = arith.constant 0 : index
    %8 = vector.load %arg4[%c0_6, %c0_7] : memref<32x64xf32, #tpu.memory_space<vmem>>, vector<32x64xf32>
    tpu.vector_store %arg4[%c0_6, %c0_7], %7 {strides = array<i32>} : memref<32x64xf32, #tpu.memory_space<vmem>>, vector<32x64xf32>,
    return
  }
  func.func @transform_0(%arg0: i32) -> (i32, i32) {
    %c0_i32 = arith.constant 0 : i32
    %c0_i32_0 = arith.constant 0 : i32
    return %arg0, %c0_i32 : i32, i32
  }
  func.func @transform_1(%arg0: i32) -> (i32, i32) {
    %c0_i32 = arith.constant 0 : i32
    %c0_i32_0 = arith.constant 0 : i32
    %c0_i32_1 = arith.constant 0 : i32
    return %c0_i32, %c0_i32_0 : i32, i32
  }
  func.func @transform_2(%arg0: i32) -> (i32, i32) {
    %c0_i32 = arith.constant 0 : i32
    %c0_i32_0 = arith.constant 0 : i32
    %c0_i32_1 = arith.constant 0 : i32
    return %c0_i32, %c0_i32_0 : i32, i32
  }
  func.func @transform_3(%arg0: i32) -> (i32, i32) {
    %c0_i32 = arith.constant 0 : i32
    %c0_i32_0 = arith.constant 0 : i32
    return %arg0, %c0_i32 : i32, i32
  }
}

module attributes {stable_mosaic.version = 11 : i64} {
  func.func @_conv_mm_kernel(%arg0: i32, %arg1: memref<32x64xbf16, #tpu.memory_space<vmem>>, %arg2: memref<64x16xbf16, #tpu.memory_space<vmem>>, %arg3: memref<1x16xf32, #tpu.memory_space<vmem>>, %arg4: memref<32x16xf32, #tpu.memory_space<vmem>>) attributes {dimension_semantics = [#tpu.dimension_semantics<parallel>], iteration_bounds = array<i64: 1>, scalar_prefetch = 0 : i64, scratch_operands = 0 : i64, tpu.core_type = #tpu.core_type<tc>, window_params = [{transform_indices = @transform_0, window_bounds = array<i64: 32, 64>}, {pipeline_mode = #tpu.pipeline_mode<synchronous>, transform_indices = @transform_1, window_bounds = array<i64: 64, 16>}, {pipeline_mode = #tpu.pipeline_mode<synchronous>, transform_indices = @transform_2, window_bounds = array<i64: 1, 16>}, {transform_indices = @transform_3, window_bounds = array<i64: 32, 16>}]} {
    %c0 = arith.constant 0 : index
    %c0_0 = arith.constant 0 : index
    %0 = vector.load %arg1[%c0, %c0_0] : memref<32x64xbf16, #tpu.memory_space<vmem>>, vector<32x64xbf16>
    %c0_1 = arith.constant 0 : index
    %c0_2 = arith.constant 0 : index
    %1 = vector.load %arg2[%c0_1, %c0_2] : memref<64x16xbf16, #tpu.memory_space<vmem>>, vector<64x16xbf16>
    %cst = arith.constant dense<0.000000e+00> : vector<32x16xf32>
    %2 = tpu.matmul %0, %1, %cst {dimension_numbers = #tpu.dot_dimension_numbers<[1], [0], [0], [1], [0, 0, 1, 1], [], []>} : vector<32x64xbf16>, vector<64x16xbf16>, vector<32x16xf32> -> vector<32x16xf32>
    %c0_3 = arith.constant 0 : index
    %c0_4 = arith.constant 0 : index
    %3 = vector.load %arg3[%c0_3, %c0_4] : memref<1x16xf32, #tpu.memory_space<vmem>>, vector<1x16xf32>
    %4 = vector.broadcast %3 : vector<1x16xf32> to vector<32x16xf32>
    %5 = arith.addf %2, %4 : vector<32x16xf32>
    %cst_5 = arith.constant 0.000000e+00 : f32
    %6 = vector.broadcast %cst_5 : f32 to vector<32x16xf32>
    %7 = arith.maximumf %5, %6 : vector<32x16xf32>
    %c0_6 = arith.constant 0 : index
    %c0_7 = arith.constant 0 : index
    %8 = vector.load %arg4[%c0_6, %c0_7] : memref<32x16xf32, #tpu.memory_space<vmem>>, vector<32x16xf32>
    tpu.vector_store %arg4[%c0_6, %c0_7], %7 {strides = array<i32>} : memref<32x16xf32, #tpu.memory_space<vmem>>, vector<32x16xf32>,
    return
  }
  func.func @transform_0(%arg0: i32) -> (i32, i32) {
    %c0_i32 = arith.constant 0 : i32
    %c0_i32_0 = arith.constant 0 : i32
    return %arg0, %c0_i32 : i32, i32
  }
  func.func @transform_1(%arg0: i32) -> (i32, i32) {
    %c0_i32 = arith.constant 0 : i32
    %c0_i32_0 = arith.constant 0 : i32
    %c0_i32_1 = arith.constant 0 : i32
    return %c0_i32, %c0_i32_0 : i32, i32
  }
  func.func @transform_2(%arg0: i32) -> (i32, i32) {
    %c0_i32 = arith.constant 0 : i32
    %c0_i32_0 = arith.constant 0 : i32
    %c0_i32_1 = arith.constant 0 : i32
    return %c0_i32, %c0_i32_0 : i32, i32
  }
  func.func @transform_3(%arg0: i32) -> (i32, i32) {
    %c0_i32 = arith.constant 0 : i32
    %c0_i32_0 = arith.constant 0 : i32
    return %arg0, %c0_i32 : i32, i32
  }
}

module attributes {stable_mosaic.version = 11 : i64} {
  func.func @_conv_mm_kernel(%arg0: i32, %arg1: memref<8x144xbf16, #tpu.memory_space<vmem>>, %arg2: memref<144x16xbf16, #tpu.memory_space<vmem>>, %arg3: memref<1x16xf32, #tpu.memory_space<vmem>>, %arg4: memref<8x16xf32, #tpu.memory_space<vmem>>) attributes {dimension_semantics = [#tpu.dimension_semantics<parallel>], iteration_bounds = array<i64: 1>, scalar_prefetch = 0 : i64, scratch_operands = 0 : i64, tpu.core_type = #tpu.core_type<tc>, window_params = [{transform_indices = @transform_0, window_bounds = array<i64: 8, 144>}, {pipeline_mode = #tpu.pipeline_mode<synchronous>, transform_indices = @transform_1, window_bounds = array<i64: 144, 16>}, {pipeline_mode = #tpu.pipeline_mode<synchronous>, transform_indices = @transform_2, window_bounds = array<i64: 1, 16>}, {transform_indices = @transform_3, window_bounds = array<i64: 8, 16>}]} {
    %c0 = arith.constant 0 : index
    %c0_0 = arith.constant 0 : index
    %0 = vector.load %arg1[%c0, %c0_0] : memref<8x144xbf16, #tpu.memory_space<vmem>>, vector<8x144xbf16>
    %c0_1 = arith.constant 0 : index
    %c0_2 = arith.constant 0 : index
    %1 = vector.load %arg2[%c0_1, %c0_2] : memref<144x16xbf16, #tpu.memory_space<vmem>>, vector<144x16xbf16>
    %cst = arith.constant dense<0.000000e+00> : vector<8x16xf32>
    %2 = tpu.matmul %0, %1, %cst {dimension_numbers = #tpu.dot_dimension_numbers<[1], [0], [0], [1], [0, 0, 1, 1], [], []>} : vector<8x144xbf16>, vector<144x16xbf16>, vector<8x16xf32> -> vector<8x16xf32>
    %c0_3 = arith.constant 0 : index
    %c0_4 = arith.constant 0 : index
    %3 = vector.load %arg3[%c0_3, %c0_4] : memref<1x16xf32, #tpu.memory_space<vmem>>, vector<1x16xf32>
    %4 = vector.broadcast %3 : vector<1x16xf32> to vector<8x16xf32>
    %5 = arith.addf %2, %4 : vector<8x16xf32>
    %c0_5 = arith.constant 0 : index
    %c0_6 = arith.constant 0 : index
    %6 = vector.load %arg4[%c0_5, %c0_6] : memref<8x16xf32, #tpu.memory_space<vmem>>, vector<8x16xf32>
    tpu.vector_store %arg4[%c0_5, %c0_6], %5 {strides = array<i32>} : memref<8x16xf32, #tpu.memory_space<vmem>>, vector<8x16xf32>,
    return
  }
  func.func @transform_0(%arg0: i32) -> (i32, i32) {
    %c0_i32 = arith.constant 0 : i32
    %c0_i32_0 = arith.constant 0 : i32
    return %arg0, %c0_i32 : i32, i32
  }
  func.func @transform_1(%arg0: i32) -> (i32, i32) {
    %c0_i32 = arith.constant 0 : i32
    %c0_i32_0 = arith.constant 0 : i32
    %c0_i32_1 = arith.constant 0 : i32
    return %c0_i32, %c0_i32_0 : i32, i32
  }
  func.func @transform_2(%arg0: i32) -> (i32, i32) {
    %c0_i32 = arith.constant 0 : i32
    %c0_i32_0 = arith.constant 0 : i32
    %c0_i32_1 = arith.constant 0 : i32
    return %c0_i32, %c0_i32_0 : i32, i32
  }
  func.func @transform_3(%arg0: i32) -> (i32, i32) {
    %c0_i32 = arith.constant 0 : i32
    %c0_i32_0 = arith.constant 0 : i32
    return %arg0, %c0_i32 : i32, i32
  }
}

module attributes {stable_mosaic.version = 11 : i64} {
  func.func @_conv_mm_kernel(%arg0: i32, %arg1: memref<32x144xbf16, #tpu.memory_space<vmem>>, %arg2: memref<144x16xbf16, #tpu.memory_space<vmem>>, %arg3: memref<1x16xf32, #tpu.memory_space<vmem>>, %arg4: memref<32x16xf32, #tpu.memory_space<vmem>>) attributes {dimension_semantics = [#tpu.dimension_semantics<parallel>], iteration_bounds = array<i64: 1>, scalar_prefetch = 0 : i64, scratch_operands = 0 : i64, tpu.core_type = #tpu.core_type<tc>, window_params = [{transform_indices = @transform_0, window_bounds = array<i64: 32, 144>}, {pipeline_mode = #tpu.pipeline_mode<synchronous>, transform_indices = @transform_1, window_bounds = array<i64: 144, 16>}, {pipeline_mode = #tpu.pipeline_mode<synchronous>, transform_indices = @transform_2, window_bounds = array<i64: 1, 16>}, {transform_indices = @transform_3, window_bounds = array<i64: 32, 16>}]} {
    %c0 = arith.constant 0 : index
    %c0_0 = arith.constant 0 : index
    %0 = vector.load %arg1[%c0, %c0_0] : memref<32x144xbf16, #tpu.memory_space<vmem>>, vector<32x144xbf16>
    %c0_1 = arith.constant 0 : index
    %c0_2 = arith.constant 0 : index
    %1 = vector.load %arg2[%c0_1, %c0_2] : memref<144x16xbf16, #tpu.memory_space<vmem>>, vector<144x16xbf16>
    %cst = arith.constant dense<0.000000e+00> : vector<32x16xf32>
    %2 = tpu.matmul %0, %1, %cst {dimension_numbers = #tpu.dot_dimension_numbers<[1], [0], [0], [1], [0, 0, 1, 1], [], []>} : vector<32x144xbf16>, vector<144x16xbf16>, vector<32x16xf32> -> vector<32x16xf32>
    %c0_3 = arith.constant 0 : index
    %c0_4 = arith.constant 0 : index
    %3 = vector.load %arg3[%c0_3, %c0_4] : memref<1x16xf32, #tpu.memory_space<vmem>>, vector<1x16xf32>
    %4 = vector.broadcast %3 : vector<1x16xf32> to vector<32x16xf32>
    %5 = arith.addf %2, %4 : vector<32x16xf32>
    %cst_5 = arith.constant 0.000000e+00 : f32
    %6 = vector.broadcast %cst_5 : f32 to vector<32x16xf32>
    %7 = arith.maximumf %5, %6 : vector<32x16xf32>
    %c0_6 = arith.constant 0 : index
    %c0_7 = arith.constant 0 : index
    %8 = vector.load %arg4[%c0_6, %c0_7] : memref<32x16xf32, #tpu.memory_space<vmem>>, vector<32x16xf32>
    tpu.vector_store %arg4[%c0_6, %c0_7], %7 {strides = array<i32>} : memref<32x16xf32, #tpu.memory_space<vmem>>, vector<32x16xf32>,
    return
  }
  func.func @transform_0(%arg0: i32) -> (i32, i32) {
    %c0_i32 = arith.constant 0 : i32
    %c0_i32_0 = arith.constant 0 : i32
    return %arg0, %c0_i32 : i32, i32
  }
  func.func @transform_1(%arg0: i32) -> (i32, i32) {
    %c0_i32 = arith.constant 0 : i32
    %c0_i32_0 = arith.constant 0 : i32
    %c0_i32_1 = arith.constant 0 : i32
    return %c0_i32, %c0_i32_0 : i32, i32
  }
  func.func @transform_2(%arg0: i32) -> (i32, i32) {
    %c0_i32 = arith.constant 0 : i32
    %c0_i32_0 = arith.constant 0 : i32
    %c0_i32_1 = arith.constant 0 : i32
    return %c0_i32, %c0_i32_0 : i32, i32
  }
  func.func @transform_3(%arg0: i32) -> (i32, i32) {
    %c0_i32 = arith.constant 0 : i32
    %c0_i32_0 = arith.constant 0 : i32
    return %arg0, %c0_i32 : i32, i32
  }
}

module attributes {stable_mosaic.version = 11 : i64} {
  func.func @_conv_mm_kernel(%arg0: i32, %arg1: memref<32x144xbf16, #tpu.memory_space<vmem>>, %arg2: memref<144x16xbf16, #tpu.memory_space<vmem>>, %arg3: memref<1x16xf32, #tpu.memory_space<vmem>>, %arg4: memref<32x16xf32, #tpu.memory_space<vmem>>, %arg5: memref<32x16xf32, #tpu.memory_space<vmem>>, %arg6: memref<32x16xf32, #tpu.memory_space<vmem>>) attributes {dimension_semantics = [#tpu.dimension_semantics<parallel>], iteration_bounds = array<i64: 1>, scalar_prefetch = 0 : i64, scratch_operands = 0 : i64, tpu.core_type = #tpu.core_type<tc>, window_params = [{transform_indices = @transform_0, window_bounds = array<i64: 32, 144>}, {pipeline_mode = #tpu.pipeline_mode<synchronous>, transform_indices = @transform_1, window_bounds = array<i64: 144, 16>}, {pipeline_mode = #tpu.pipeline_mode<synchronous>, transform_indices = @transform_2, window_bounds = array<i64: 1, 16>}, {transform_indices = @transform_3, window_bounds = array<i64: 32, 16>}, {transform_indices = @transform_4, window_bounds = array<i64: 32, 16>}, {transform_indices = @transform_5, window_bounds = array<i64: 32, 16>}]} {
    %c0 = arith.constant 0 : index
    %c0_0 = arith.constant 0 : index
    %0 = vector.load %arg1[%c0, %c0_0] : memref<32x144xbf16, #tpu.memory_space<vmem>>, vector<32x144xbf16>
    %c0_1 = arith.constant 0 : index
    %c0_2 = arith.constant 0 : index
    %1 = vector.load %arg2[%c0_1, %c0_2] : memref<144x16xbf16, #tpu.memory_space<vmem>>, vector<144x16xbf16>
    %cst = arith.constant dense<0.000000e+00> : vector<32x16xf32>
    %2 = tpu.matmul %0, %1, %cst {dimension_numbers = #tpu.dot_dimension_numbers<[1], [0], [0], [1], [0, 0, 1, 1], [], []>} : vector<32x144xbf16>, vector<144x16xbf16>, vector<32x16xf32> -> vector<32x16xf32>
    %c0_3 = arith.constant 0 : index
    %c0_4 = arith.constant 0 : index
    %3 = vector.load %arg3[%c0_3, %c0_4] : memref<1x16xf32, #tpu.memory_space<vmem>>, vector<1x16xf32>
    %4 = vector.broadcast %3 : vector<1x16xf32> to vector<32x16xf32>
    %5 = arith.addf %2, %4 : vector<32x16xf32>
    %c0_5 = arith.constant 0 : index
    %c0_6 = arith.constant 0 : index
    %6 = vector.load %arg4[%c0_5, %c0_6] : memref<32x16xf32, #tpu.memory_space<vmem>>, vector<32x16xf32>
    %c0_7 = arith.constant 0 : index
    %c0_8 = arith.constant 0 : index
    %7 = vector.load %arg5[%c0_7, %c0_8] : memref<32x16xf32, #tpu.memory_space<vmem>>, vector<32x16xf32>
    %8 = arith.addf %6, %7 : vector<32x16xf32>
    %cst_9 = arith.constant 0.000000e+00 : f32
    %9 = vector.broadcast %cst_9 : f32 to vector<32x16xf32>
    %10 = arith.subf %9, %8 : vector<32x16xf32>
    %11 = math.exp %10 : vector<32x16xf32>
    %cst_10 = arith.constant 1.000000e+00 : f32
    %12 = vector.broadcast %cst_10 : f32 to vector<32x16xf32>
    %13 = arith.addf %12, %11 : vector<32x16xf32>
    %14 = tpu.reciprocal %13 {approx = true} : vector<32x16xf32> -> vector<32x16xf32>
    %15 = arith.mulf %5, %14 : vector<32x16xf32>
    %c0_11 = arith.constant 0 : index
    %c0_12 = arith.constant 0 : index
    %16 = vector.load %arg6[%c0_11, %c0_12] : memref<32x16xf32, #tpu.memory_space<vmem>>, vector<32x16xf32>
    tpu.vector_store %arg6[%c0_11, %c0_12], %15 {strides = array<i32>} : memref<32x16xf32, #tpu.memory_space<vmem>>, vector<32x16xf32>,
    return
  }
  func.func @transform_0(%arg0: i32) -> (i32, i32) {
    %c0_i32 = arith.constant 0 : i32
    %c0_i32_0 = arith.constant 0 : i32
    return %arg0, %c0_i32 : i32, i32
  }
  func.func @transform_1(%arg0: i32) -> (i32, i32) {
    %c0_i32 = arith.constant 0 : i32
    %c0_i32_0 = arith.constant 0 : i32
    %c0_i32_1 = arith.constant 0 : i32
    return %c0_i32, %c0_i32_0 : i32, i32
  }
  func.func @transform_2(%arg0: i32) -> (i32, i32) {
    %c0_i32 = arith.constant 0 : i32
    %c0_i32_0 = arith.constant 0 : i32
    %c0_i32_1 = arith.constant 0 : i32
    return %c0_i32, %c0_i32_0 : i32, i32
  }
  func.func @transform_3(%arg0: i32) -> (i32, i32) {
    %c0_i32 = arith.constant 0 : i32
    %c0_i32_0 = arith.constant 0 : i32
    return %arg0, %c0_i32 : i32, i32
  }
  func.func @transform_4(%arg0: i32) -> (i32, i32) {
    %c0_i32 = arith.constant 0 : i32
    %c0_i32_0 = arith.constant 0 : i32
    return %arg0, %c0_i32 : i32, i32
  }
  func.func @transform_5(%arg0: i32) -> (i32, i32) {
    %c0_i32 = arith.constant 0 : i32
    %c0_i32_0 = arith.constant 0 : i32
    return %arg0, %c0_i32 : i32, i32
  }
}

module attributes {stable_mosaic.version = 11 : i64} {
  func.func @_conv_mm_kernel(%arg0: i32, %arg1: memref<32x16xbf16, #tpu.memory_space<vmem>>, %arg2: memref<16x64xbf16, #tpu.memory_space<vmem>>, %arg3: memref<1x64xf32, #tpu.memory_space<vmem>>, %arg4: memref<32x64xf32, #tpu.memory_space<vmem>>, %arg5: memref<32x64xf32, #tpu.memory_space<vmem>>) attributes {dimension_semantics = [#tpu.dimension_semantics<parallel>], iteration_bounds = array<i64: 1>, scalar_prefetch = 0 : i64, scratch_operands = 0 : i64, tpu.core_type = #tpu.core_type<tc>, window_params = [{transform_indices = @transform_0, window_bounds = array<i64: 32, 16>}, {pipeline_mode = #tpu.pipeline_mode<synchronous>, transform_indices = @transform_1, window_bounds = array<i64: 16, 64>}, {pipeline_mode = #tpu.pipeline_mode<synchronous>, transform_indices = @transform_2, window_bounds = array<i64: 1, 64>}, {transform_indices = @transform_3, window_bounds = array<i64: 32, 64>}, {transform_indices = @transform_4, window_bounds = array<i64: 32, 64>}]} {
    %c0 = arith.constant 0 : index
    %c0_0 = arith.constant 0 : index
    %0 = vector.load %arg1[%c0, %c0_0] : memref<32x16xbf16, #tpu.memory_space<vmem>>, vector<32x16xbf16>
    %c0_1 = arith.constant 0 : index
    %c0_2 = arith.constant 0 : index
    %1 = vector.load %arg2[%c0_1, %c0_2] : memref<16x64xbf16, #tpu.memory_space<vmem>>, vector<16x64xbf16>
    %cst = arith.constant dense<0.000000e+00> : vector<32x64xf32>
    %2 = tpu.matmul %0, %1, %cst {dimension_numbers = #tpu.dot_dimension_numbers<[1], [0], [0], [1], [0, 0, 1, 1], [], []>} : vector<32x16xbf16>, vector<16x64xbf16>, vector<32x64xf32> -> vector<32x64xf32>
    %c0_3 = arith.constant 0 : index
    %c0_4 = arith.constant 0 : index
    %3 = vector.load %arg3[%c0_3, %c0_4] : memref<1x64xf32, #tpu.memory_space<vmem>>, vector<1x64xf32>
    %4 = vector.broadcast %3 : vector<1x64xf32> to vector<32x64xf32>
    %5 = arith.addf %2, %4 : vector<32x64xf32>
    %c0_5 = arith.constant 0 : index
    %c0_6 = arith.constant 0 : index
    %6 = vector.load %arg4[%c0_5, %c0_6] : memref<32x64xf32, #tpu.memory_space<vmem>>, vector<32x64xf32>
    %7 = arith.addf %5, %6 : vector<32x64xf32>
    %cst_7 = arith.constant 0.000000e+00 : f32
    %8 = vector.broadcast %cst_7 : f32 to vector<32x64xf32>
    %9 = arith.maximumf %7, %8 : vector<32x64xf32>
    %c0_8 = arith.constant 0 : index
    %c0_9 = arith.constant 0 : index
    %10 = vector.load %arg5[%c0_8, %c0_9] : memref<32x64xf32, #tpu.memory_space<vmem>>, vector<32x64xf32>
    tpu.vector_store %arg5[%c0_8, %c0_9], %9 {strides = array<i32>} : memref<32x64xf32, #tpu.memory_space<vmem>>, vector<32x64xf32>,
    return
  }
  func.func @transform_0(%arg0: i32) -> (i32, i32) {
    %c0_i32 = arith.constant 0 : i32
    %c0_i32_0 = arith.constant 0 : i32
    return %arg0, %c0_i32 : i32, i32
  }
  func.func @transform_1(%arg0: i32) -> (i32, i32) {
    %c0_i32 = arith.constant 0 : i32
    %c0_i32_0 = arith.constant 0 : i32
    %c0_i32_1 = arith.constant 0 : i32
    return %c0_i32, %c0_i32_0 : i32, i32
  }
  func.func @transform_2(%arg0: i32) -> (i32, i32) {
    %c0_i32 = arith.constant 0 : i32
    %c0_i32_0 = arith.constant 0 : i32
    %c0_i32_1 = arith.constant 0 : i32
    return %c0_i32, %c0_i32_0 : i32, i32
  }
  func.func @transform_3(%arg0: i32) -> (i32, i32) {
    %c0_i32 = arith.constant 0 : i32
    %c0_i32_0 = arith.constant 0 : i32
    return %arg0, %c0_i32 : i32, i32
  }
  func.func @transform_4(%arg0: i32) -> (i32, i32) {
    %c0_i32 = arith.constant 0 : i32
    %c0_i32_0 = arith.constant 0 : i32
    return %arg0, %c0_i32 : i32, i32
  }
}

</mosaic_0001>

<bundles_post_ra>
// kernel: scnet_forward.13
= control target key start
LH: loop header
LB: loop body
LE: loop exit
PB: predicated region body
PF: predicated region fallthrough
CT: control target
= control target key end

     0   :  { %vm94_vm0 = vcmask 261120   ;;  %vm232_vm1 = vcmask 64512   ;;  %s441_s1 = inlined_call_operand.vmem [shape: bf16[32,8], index: 1, kind: input, shape index: {}]   ;;  %s442_s0 = inlined_call_operand.vmem [shape: bf16[128,32], index: 0, kind: input, shape index: {}]   ;;  %s443_s2 = inlined_call_operand.vmem [shape: f32[1,8], index: 2, kind: input, shape index: {}]   ;;  %s444_s3 = inlined_call_operand.vmem [shape: f32[128,8], index: 3, kind: output, shape index: {}]  }
   0x1   :  { %v306_v0 = vld [vmem:[%s441_s1] sm:$0xff]   ;;  %v307_v1 = vld [vmem:[%s441_s1 + $0x8] sm:$0xff]   ;;  %v312_v6 = vld [vmem:[%s442_s0 + $0x10] sm:$0xff]  }
   0x2   :  { %282 = vmatprep.subr.bf16.mxu0 %v306_v0  ;;  %302 = vmatprep.subr.bf16.mxu1 %v306_v0  ;;  %v308_v2 = vld [vmem:[%s442_s0] sm:$0xff]   ;;  %v310_v4 = vld [vmem:[%s442_s0 + $0x8] sm:$0xff]   ;;  %v313_v7 = vld [vmem:[%s442_s0 + $0x30] sm:$0xff]  }
   0x3   :  { %283 = vmatpush3.bf16.msra.mxu0 %v306_v0  ;;  %304 = vmatpush3.bf16.msra.mxu1 %v306_v0  ;;  %v309_v3 = vld [vmem:[%s442_s0 + $0x20] sm:$0xff]   ;;  %v311_v5 = vld [vmem:[%s442_s0 + $0x28] sm:$0xff]   ;;  %v314_v8 = vld [vmem:[%s442_s0 + $0x18] sm:$0xff]  }
   0x4   :  { %284 = vmatprep.subr.bf16.mxu0 %v307_v1  ;;  %303 = vmatprep.subr.bf16.mxu1 %v307_v1  ;;  %v315_v9 = vld [vmem:[%s442_s0 + $0x38] sm:$0xff]   ;;  %v253_v10 = vld [vmem:[%s443_s2] ss:$0 sm:$0xff] }
   0x5   :  { %286 = vmatprep.mubr.msk.bf16.mxu0 %vm94_vm0, %v308_v2  ;;  %294 = vmatprep.mubr.msk.bf16.mxu1 %vm94_vm0, %v309_v3 }
   0x7   :  { %285 = vmatpush3.bf16.msra.mxu0 %v307_v1  ;;  %305 = vmatpush3.bf16.msra.mxu1 %v307_v1 }
   0xa   :  { %287 = vmatmul.mubr.msk.bf16.vlgmr.msra.gmra.mrb[0].mxu0 %vm94_vm0, %v310_v4  ;;  %295 = vmatmul.mubr.msk.bf16.vlgmr.msra.gmra.mrb[0].mxu1 %vm94_vm0, %v311_v5 }
   0xb   :  { %290 = vmatprep.mubr.msk.bf16.mxu0 %vm94_vm0, %v312_v6  ;;  %298 = vmatprep.mubr.msk.bf16.mxu1 %vm94_vm0, %v313_v7 }
  0x12   :  { %291 = vmatmul.mubr.msk.bf16.gmra.mrb[4].mxu0 %vm94_vm0, %v314_v8  ;;  %299 = vmatmul.mubr.msk.bf16.gmra.mrb[4].mxu1 %vm94_vm0, %v315_v9 }
  0xdd   :  { %v288_v11 = vpop.f32.mrb[0].mxu0  ;;  %v296_v12 = vpop.f32.mrb[0].mxu1 }
  0xde   :  { %v162_v13 = vadd.f32 %v288_v11, %v253_v10  ;;  %v194_v14 = vadd.f32 %v296_v12, %v253_v10  ;;  %v153_v15 = vpop.f32.mrb[1].mxu0  ;;  %v185_v16 = vpop.f32.mrb[1].mxu1 }
  0xdf   :  { %v154_v17 = vadd.f32 %v253_v10, %v153_v15  ;;  %v186_v18 = vadd.f32 %v253_v10, %v185_v16  ;;  %v289_v19 = vpop.f32.mrb[2].mxu0  ;;  %v297_v20 = vpop.f32.mrb[2].mxu1 }
  0xe0   :  { %v218_v21 = vmax.f32 %v162_v13, 0.0  ;;  %v226_v22 = vmax.f32 %v194_v14, 0.0  ;;  %v165_v23 = vadd.f32 %v289_v19, %v253_v10  ;;  %v197_v24 = vadd.f32 %v297_v20, %v253_v10  ;;  %v156_v25 = vpop.f32.mrb[3].mxu0  ;;  %v188_v26 = vpop.f32.mrb[3].mxu1 }
  0xe1   :  { %v216_v27 = vmax.f32 %v154_v17, 0.0  ;;  %v224_v28 = vmax.f32 %v186_v18, 0.0  ;;  %v157_v29 = vadd.f32 %v253_v10, %v156_v25  ;;  %v189_v30 = vadd.f32 %v253_v10, %v188_v26 }
  0xe2   :  { %235 = vst.msk [vmem:[%s444_s3 + $0x10] sm:$0xff] %vm232_vm1, %v218_v21  ;;  %243 = vst.msk [vmem:[%s444_s3 + $0x50] sm:$0xff] %vm232_vm1, %v226_v22  ;;  %v219_v31 = vmax.f32 %v165_v23, 0.0  ;;  %v227_v32 = vmax.f32 %v197_v24, 0.0 }
  0xe3   :  { %233 = vst.msk [vmem:[%s444_s3] sm:$0xff] %vm232_vm1, %v216_v27  ;;  %241 = vst.msk [vmem:[%s444_s3 + $0x40] sm:$0xff] %vm232_vm1, %v224_v28  ;;  %v217_v33 = vmax.f32 %v157_v29, 0.0  ;;  %v225_v34 = vmax.f32 %v189_v30, 0.0 }
  0xe4   :  { %236 = vst.msk [vmem:[%s444_s3 + $0x18] sm:$0xff] %vm232_vm1, %v219_v31  ;;  %244 = vst.msk [vmem:[%s444_s3 + $0x58] sm:$0xff] %vm232_vm1, %v227_v32 }
  0xe5   :  { %234 = vst.msk [vmem:[%s444_s3 + $0x8] sm:$0xff] %vm232_vm1, %v217_v33  ;;  %242 = vst.msk [vmem:[%s444_s3 + $0x48] sm:$0xff] %vm232_vm1, %v225_v34  ;;  %v292_v35 = vpop.f32.mrb[4].mxu0  ;;  %v300_v36 = vpop.f32.mrb[4].mxu1 }
  0xe6   :  { %v178_v37 = vadd.f32 %v292_v35, %v253_v10  ;;  %v210_v38 = vadd.f32 %v300_v36, %v253_v10  ;;  %v169_v39 = vpop.f32.mrb[5].mxu0  ;;  %v201_v40 = vpop.f32.mrb[5].mxu1 }
  0xe7   :  { %v170_v41 = vadd.f32 %v253_v10, %v169_v39  ;;  %v202_v42 = vadd.f32 %v253_v10, %v201_v40  ;;  %v293_v43 = vpop.f32.mrb[6].mxu0  ;;  %v301_v44 = vpop.f32.mrb[6].mxu1 }
  0xe8   :  { %v222_v45 = vmax.f32 %v178_v37, 0.0  ;;  %v230_v46 = vmax.f32 %v210_v38, 0.0  ;;  %v181_v47 = vadd.f32 %v293_v43, %v253_v10  ;;  %v213_v48 = vadd.f32 %v301_v44, %v253_v10  ;;  %v172_v49 = vpop.f32.mrb[7].mxu0  ;;  %v204_v50 = vpop.f32.mrb[7].mxu1 }
  0xe9   :  { %v220_v51 = vmax.f32 %v170_v41, 0.0  ;;  %v228_v52 = vmax.f32 %v202_v42, 0.0  ;;  %v173_v53 = vadd.f32 %v253_v10, %v172_v49  ;;  %v205_v54 = vadd.f32 %v253_v10, %v204_v50 }
  0xea   :  { %239 = vst.msk [vmem:[%s444_s3 + $0x30] sm:$0xff] %vm232_vm1, %v222_v45  ;;  %247 = vst.msk [vmem:[%s444_s3 + $0x70] sm:$0xff] %vm232_vm1, %v230_v46  ;;  %v223_v55 = vmax.f32 %v181_v47, 0.0  ;;  %v231_v56 = vmax.f32 %v213_v48, 0.0 }
  0xeb   :  { %237 = vst.msk [vmem:[%s444_s3 + $0x20] sm:$0xff] %vm232_vm1, %v220_v51  ;;  %245 = vst.msk [vmem:[%s444_s3 + $0x60] sm:$0xff] %vm232_vm1, %v228_v52  ;;  %v221_v57 = vmax.f32 %v173_v53, 0.0  ;;  %v229_v58 = vmax.f32 %v205_v54, 0.0 }
  0xec   :  { %240 = vst.msk [vmem:[%s444_s3 + $0x38] sm:$0xff] %vm232_vm1, %v223_v55  ;;  %248 = vst.msk [vmem:[%s444_s3 + $0x78] sm:$0xff] %vm232_vm1, %v231_v56 }
  0xed   :  { %238 = vst.msk [vmem:[%s444_s3 + $0x28] sm:$0xff] %vm232_vm1, %v221_v57  ;;  %246 = vst.msk [vmem:[%s444_s3 + $0x68] sm:$0xff] %vm232_vm1, %v229_v58 }

// kernel: scnet_forward.12
= control target key start
LH: loop header
LB: loop body
LE: loop exit
PB: predicated region body
PF: predicated region fallthrough
CT: control target
= control target key end

     0   :  { %vm318_vm0 = vcmask 261120   ;;  %s1035_s1 = inlined_call_operand.vmem [shape: bf16[288,32], index: 1, kind: input, shape index: {}]   ;;  %s1036_s0 = inlined_call_operand.vmem [shape: bf16[128,288], index: 0, kind: input, shape index: {}]   ;;  %s1037_s2 = inlined_call_operand.vmem [shape: f32[1,32], index: 2, kind: input, shape index: {}]   ;;  %s1038_s3 = inlined_call_operand.vmem [shape: f32[128,32], index: 3, kind: output, shape index: {}]  }
   0x1   :  { %v734_v0 = vld [vmem:[%s1035_s1 + $0x40] sm:$0xff]   ;;  %v736_v2 = vld [vmem:[%s1035_s1 + $0x48] sm:$0xff]   ;;  %v738_v4 = vld [vmem:[%s1035_s1 + $0x50] sm:$0xff]  }
   0x2   :  { %v735_v1 = vld [vmem:[%s1035_s1] sm:$0xff]   ;;  %624 = vmatprep.subr.bf16.mxu0 %v734_v0  ;;  %718 = vmatprep.subr.bf16.mxu1 %v734_v0  ;;  %v737_v3 = vld [vmem:[%s1035_s1 + $0x8] sm:$0xff]   ;;  %v739_v5 = vld [vmem:[%s1035_s1 + $0x10] sm:$0xff]  }
   0x3   :  { %625 = vmatpush3.bf16.msra.mxu0 %v735_v1  ;;  %726 = vmatpush3.bf16.msra.mxu1 %v735_v1  ;;  %v740_v6 = vld [vmem:[%s1035_s1 + $0x58] sm:$0xff]   ;;  %v742_v8 = vld [vmem:[%s1035_s1 + $0x60] sm:$0xff]   ;;  %v744_v10 = vld [vmem:[%s1035_s1 + $0x68] sm:$0xff]  }
   0x4   :  { %626 = vmatprep.subr.bf16.mxu0 %v736_v2  ;;  %719 = vmatprep.subr.bf16.mxu1 %v736_v2  ;;  %v741_v7 = vld [vmem:[%s1035_s1 + $0x18] sm:$0xff]   ;;  %v743_v9 = vld [vmem:[%s1035_s1 + $0x20] sm:$0xff]   ;;  %v745_v13 = vld [vmem:[%s1035_s1 + $0x28] sm:$0xff]  }
   0x5   :  { %v752_v11 = vld [vmem:[%s1036_s0 + $0x4] ss:$12 sps:$4 sm:$0xff]   ;;  %v755_v12 = vld [vmem:[%s1036_s0 + $0x94] ss:$12 sps:$4 sm:$0xff]   ;;  %v748_v16 = vld [vmem:[%s1035_s1 + $0x78] sm:$0xff]  }
   0x6   :  { %v746_v14 = vld [vmem:[%s1035_s1 + $0x70] sm:$0xff]   ;;  %375 = vmatprep.mubr.bf16.mxu0 %v752_v11  ;;  %423 = vmatprep.mubr.bf16.mxu1 %v755_v12  ;;  %v749_v17 = vld [vmem:[%s1035_s1 + $0x38] sm:$0xff]   ;;  %v750_v18 = vld [vmem:[%s1036_s0] ss:$12 sps:$4 sm:$0xff]  }
   0x7   :  { %627 = vmatpush3.bf16.msra.mxu0 %v737_v3  ;;  %727 = vmatpush3.bf16.msra.mxu1 %v737_v3  ;;  %v747_v15 = vld [vmem:[%s1035_s1 + $0x30] sm:$0xff]   ;;  %v756_v19 = vld [vmem:[%s1035_s1 + $0x80] sm:$0xff]   ;;  %v757_v21 = vld [vmem:[%s1036_s0 + $0x1c] ss:$12 sps:$4 sm:$0xff]  }
   0x8   :  { %628 = vmatprep.subr.bf16.mxu0 %v738_v4  ;;  %720 = vmatprep.subr.bf16.mxu1 %v738_v4  ;;  %v753_v20 = vld [vmem:[%s1036_s0 + $0x90] ss:$12 sps:$4 sm:$0xff]   ;;  %v759_v22 = vld [vmem:[%s1036_s0 + $0xac] ss:$12 sps:$4 sm:$0xff]   ;;  %v762_v25 = vld [vmem:[%s1036_s0 + $0xa8] ss:$12 sps:$4 sm:$0xff]  }
   0x9   :  { %v763_v23 = vld [vmem:[%s1035_s1 + $0x88] sm:$0xff]   ;;  %v761_v24 = vld [vmem:[%s1036_s0 + $0x18] ss:$12 sps:$4 sm:$0xff]   ;;  %v764_v26 = vld [vmem:[%s1036_s0 + $0x34] ss:$12 sps:$4 sm:$0xff]  }
   0xa   :  { %v766_v27 = vld [vmem:[%s1036_s0 + $0x8] ss:$12 sps:$4 sm:$0xff]   ;;  %v767_v28 = vld [vmem:[%s1036_s0 + $0x30] ss:$12 sps:$4 sm:$0xff]   ;;  %v768_v29 = vld [vmem:[%s1036_s0 + $0x20] ss:$12 sps:$4 sm:$0xff]  }
   0xb   :  { %629 = vmatpush3.bf16.msra.mxu0 %v739_v5  ;;  %728 = vmatpush3.bf16.msra.mxu1 %v739_v5  ;;  %v769_v30 = vld [vmem:[%s1036_s0 + $0x4c] ss:$12 sps:$4 sm:$0xff]   ;;  %v772_v32 = vld [vmem:[%s1036_s0 + $0x48] ss:$12 sps:$4 sm:$0xff]   ;;  %v773_v33 = vld [vmem:[%s1036_s0 + $0x50] ss:$12 sps:$4 sm:$0xff]  }
   0xc   :  { %630 = vmatprep.subr.bf16.mxu0 %v740_v6  ;;  %721 = vmatprep.subr.bf16.mxu1 %v740_v6  ;;  %v771_v31 = vld [vmem:[%s1036_s0 + $0x38] ss:$12 sps:$4 sm:$0xff]   ;;  %v776_v35 = vld [vmem:[%s1036_s0 + $0x68] ss:$12 sps:$4 sm:$0xff]   ;;  %v777_v36 = vld [vmem:[%s1036_s0 + $0x60] ss:$12 sps:$4 sm:$0xff]  }
   0xd   :  { %v774_v34 = vld [vmem:[%s1036_s0 + $0x64] ss:$12 sps:$4 sm:$0xff]   ;;  %v778_v37 = vld [vmem:[%s1036_s0 + $0x80] ss:$12 sps:$4 sm:$0xff]   ;;  %v779_v38 = vld [vmem:[%s1036_s0 + $0x7c] ss:$12 sps:$4 sm:$0xff]  }
   0xe   :  { %v781_v39 = vld [vmem:[%s1036_s0 + $0x98] ss:$12 sps:$4 sm:$0xff]   ;;  %v783_v41 = vld [vmem:[%s1036_s0 + $0xb0] ss:$12 sps:$4 sm:$0xff]   ;;  %v949_v2 = vld [vmem:[%s1037_s2] ss:$0 sm:$0xff] }
   0xf   :  { %631 = vmatpush3.bf16.msra.mxu0 %v741_v7  ;;  %729 = vmatpush3.bf16.msra.mxu1 %v741_v7  ;;  %v782_v40 = vld [vmem:[%s1036_s0 + $0x78] ss:$12 sps:$4 sm:$0xff]  }
  0x10   :  { %632 = vmatprep.subr.bf16.mxu0 %v742_v8  ;;  %722 = vmatprep.subr.bf16.mxu1 %v742_v8 }
  0x13   :  { %633 = vmatpush3.bf16.msra.mxu0 %v743_v9  ;;  %730 = vmatpush3.bf16.msra.mxu1 %v743_v9 }
  0x14   :  { %634 = vmatprep.subr.bf16.mxu0 %v744_v10  ;;  %723 = vmatprep.subr.bf16.mxu1 %v744_v10 }
  0x17   :  { %635 = vmatpush3.bf16.msra.mxu0 %v745_v13  ;;  %731 = vmatpush3.bf16.msra.mxu1 %v745_v13 }
  0x18   :  { %636 = vmatprep.subr.bf16.mxu0 %v746_v14  ;;  %724 = vmatprep.subr.bf16.mxu1 %v746_v14 }
  0x1b   :  { %637 = vmatpush3.bf16.msra.mxu0 %v747_v15  ;;  %732 = vmatpush3.bf16.msra.mxu1 %v747_v15 }
  0x1c   :  { %638 = vmatprep.subr.bf16.mxu0 %v748_v16  ;;  %725 = vmatprep.subr.bf16.mxu1 %v748_v16 }
  0x1f   :  { %639 = vmatpush3.bf16.msra.mxu0 %v749_v17  ;;  %733 = vmatpush3.bf16.msra.mxu1 %v749_v17 }
  0x20   :  { %698 = vmatprep.subr.bf16.mxu1 %v756_v19 }
  0x22   :  { %376 = vmatmul.mubr.bf16.vlgmr.msra.gmra.mrb[0].mxu0 %v750_v18  ;;  %424 = vmatmul.mubr.bf16.vlgmr.msra.gmra.mrb[0].mxu1 %v753_v20 }
  0x23   :  { %699 = vmatpush3.bf16.msra.mxu1 %v756_v19  ;;  %383 = vmatprep.mubr.bf16.mxu0 %v757_v21 }
  0x24   :  { %431 = vmatprep.mubr.bf16.mxu1 %v759_v22  ;;  %700 = vmatprep.subr.bf16.mxu1 %v763_v23 }
  0x27   :  { %701 = vmatpush3.bf16.msra.mxu1 %v763_v23 }
  0x2a   :  { %384 = vmatmul.mubr.bf16.gmra.mrb[4].mxu0 %v761_v24  ;;  %432 = vmatmul.mubr.bf16.gmra.mrb[4].mxu1 %v762_v25 }
  0x2b   :  { %391 = vmatprep.mubr.bf16.mxu0 %v764_v26  ;;  %702 = vmatprep.mubr.msk.bf16.mxu1 %vm318_vm0, %v766_v27 }
  0x32   :  { %392 = vmatmul.mubr.bf16.gmra.mrb[8].mxu0 %v767_v28  ;;  %703 = vmatmul.mubr.msk.bf16.vlgmr.msra.gmra.mrb[8].mxu1 %vm318_vm0, %v768_v29 }
  0x33   :  { %399 = vmatprep.mubr.bf16.mxu0 %v769_v30  ;;  %706 = vmatprep.mubr.msk.bf16.mxu1 %vm318_vm0, %v771_v31 }
  0x3a   :  { %400 = vmatmul.mubr.bf16.gmra.mrb[12].mxu0 %v772_v32  ;;  %707 = vmatmul.mubr.msk.bf16.gmra.mrb[12].mxu1 %vm318_vm0, %v773_v33 }
  0x3b   :  { %407 = vmatprep.mubr.bf16.mxu0 %v774_v34  ;;  %710 = vmatprep.mubr.msk.bf16.mxu1 %vm318_vm0, %v776_v35 }
  0x42   :  { %408 = vmatmul.mubr.bf16.gmra.mrb[16].mxu0 %v777_v36  ;;  %711 = vmatmul.mubr.msk.bf16.gmra.mrb[16].mxu1 %vm318_vm0, %v778_v37 }
  0x43   :  { %415 = vmatprep.mubr.bf16.mxu0 %v779_v38  ;;  %714 = vmatprep.mubr.msk.bf16.mxu1 %vm318_vm0, %v781_v39 }
  0x4a   :  { %416 = vmatmul.mubr.bf16.gmra.mrb[20].mxu0 %v782_v40  ;;  %715 = vmatmul.mubr.msk.bf16.gmra.mrb[20].mxu1 %vm318_vm0, %v783_v41 }
  0xf5   :  { %v640_v42 = vpop.f32.mrb[0].mxu0  ;;  %v676_v43 = vpop.f32.mrb[0].mxu1 }
  0xf6   :  { %v641_v44 = vpop.f32.mrb[1].mxu0  ;;  %v677_v45 = vpop.f32.mrb[1].mxu1 }
  0xf7   :  { %v642_v46 = vadd.f32 %v641_v44, %v640_v42  ;;  %v643_v47 = vpop.f32.mrb[2].mxu0  ;;  %v938_v48 = vadd.f32 %v677_v45, %v676_v43  ;;  %v679_v49 = vpop.f32.mrb[2].mxu1 }
  0xf8   :  { %v644_v50 = vpop.f32.mrb[3].mxu0  ;;  %v680_v51 = vpop.f32.mrb[3].mxu1 }
  0xf9   :  { %v645_v52 = vadd.f32 %v644_v50, %v643_v47  ;;  %v940_v53 = vadd.f32 %v680_v51, %v679_v49  ;;  %v378_v6 = vadd.f32 %v642_v46, %v949_v2 }
  0xfb   :  { %v381_v15 = vadd.f32 %v645_v52, %v949_v2 }
  0xfd   :  { %v646_v54 = vpop.f32.mrb[4].mxu0  ;;  %v682_v55 = vpop.f32.mrb[4].mxu1 }
  0xfe   :  { %v647_v56 = vpop.f32.mrb[5].mxu0  ;;  %v683_v57 = vpop.f32.mrb[5].mxu1 }
  0xff   :  { %v648_v58 = vadd.f32 %v647_v56, %v646_v54  ;;  %v649_v59 = vpop.f32.mrb[6].mxu0  ;;  %v942_v60 = vadd.f32 %v683_v57, %v682_v55  ;;  %v685_v61 = vpop.f32.mrb[6].mxu1 }
 0x100   :  { %v650_v62 = vpop.f32.mrb[7].mxu0  ;;  %v686_v63 = vpop.f32.mrb[7].mxu1 }
 0x101   :  { %v651_v0 = vadd.f32 %v650_v62, %v649_v59  ;;  %v944_v1 = vadd.f32 %v686_v63, %v685_v61  ;;  %v386_v3 = vadd.f32 %v648_v58, %v949_v2  ;;  %v434_v63 = vadd.f32 %v942_v60, %v949_v2 }
 0x103   :  { %v389_v10 = vadd.f32 %v651_v0, %v949_v2 }
 0x105   :  { %v652_v4 = vpop.f32.mrb[8].mxu0  ;;  %v704_v5 = vpop.f32.mrb[8].mxu1 }
 0x106   :  { %v483_v7 = vadd.f32 %v704_v5, %v386_v3  ;;  %v653_v8 = vpop.f32.mrb[9].mxu0  ;;  %v474_v9 = vpop.f32.mrb[9].mxu1 }
 0x107   :  { %v654_v11 = vadd.f32 %v653_v8, %v652_v4  ;;  %v475_v12 = vadd.f32 %v474_v9, %v378_v6  ;;  %v655_v13 = vpop.f32.mrb[10].mxu0  ;;  %v705_v14 = vpop.f32.mrb[10].mxu1  ;;  %v426_v6 = vadd.f32 %v938_v48, %v949_v2 }
 0x108   :  { %v539_v16 = vmax.f32 %v483_v7, 0.0  ;;  %v486_v17 = vadd.f32 %v705_v14, %v389_v10  ;;  %v656_v18 = vpop.f32.mrb[11].mxu0  ;;  %v477_v19 = vpop.f32.mrb[11].mxu1  ;;  %v437_v10 = vadd.f32 %v944_v1, %v949_v2 }
 0x109   :  { %v537_v20 = vmax.f32 %v475_v12, 0.0  ;;  %v657_v21 = vadd.f32 %v656_v18, %v655_v13  ;;  %v478_v22 = vadd.f32 %v477_v19, %v381_v15  ;;  %v394_v27 = vadd.f32 %v654_v11, %v949_v2 }
 0x10a   :  { %555 = vst.msk [vmem:[%s1038_s3 + $0x10] sm:$0xff] %vm318_vm0, %v539_v16  ;;  %v540_v23 = vmax.f32 %v486_v17, 0.0  ;;  %v429_v15 = vadd.f32 %v940_v53, %v949_v2 }
 0x10b   :  { %553 = vst.msk [vmem:[%s1038_s3] sm:$0xff] %vm318_vm0, %v537_v20  ;;  %v538_v24 = vmax.f32 %v478_v22, 0.0  ;;  %v397_v34 = vadd.f32 %v657_v21, %v949_v2 }
 0x10c   :  { %556 = vst.msk [vmem:[%s1038_s3 + $0x18] sm:$0xff] %vm318_vm0, %v540_v23 }
 0x10d   :  { %554 = vst.msk [vmem:[%s1038_s3 + $0x8] sm:$0xff] %vm318_vm0, %v538_v24  ;;  %v658_v25 = vpop.f32.mrb[12].mxu0  ;;  %v708_v26 = vpop.f32.mrb[12].mxu1 }
 0x10e   :  { %v659_v28 = vpop.f32.mrb[13].mxu0  ;;  %v490_v29 = vpop.f32.mrb[13].mxu1 }
 0x10f   :  { %v660_v30 = vadd.f32 %v659_v28, %v658_v25  ;;  %v491_v31 = vadd.f32 %v490_v29, %v394_v27  ;;  %v661_v32 = vpop.f32.mrb[14].mxu0  ;;  %v709_v33 = vpop.f32.mrb[14].mxu1 }
 0x110   :  { %v662_v35 = vpop.f32.mrb[15].mxu0  ;;  %v493_v36 = vpop.f32.mrb[15].mxu1 }
 0x111   :  { %v402_v37 = vadd.f32 %v660_v30, %v949_v2  ;;  %v541_v38 = vmax.f32 %v491_v31, 0.0  ;;  %v663_v39 = vadd.f32 %v662_v35, %v661_v32  ;;  %v494_v40 = vadd.f32 %v493_v36, %v397_v34 }
 0x113   :  { %v499_v41 = vadd.f32 %v708_v26, %v402_v37  ;;  %557 = vst.msk [vmem:[%s1038_s3 + $0x20] sm:$0xff] %vm318_vm0, %v541_v38  ;;  %v405_v42 = vadd.f32 %v663_v39, %v949_v2  ;;  %v542_v43 = vmax.f32 %v494_v40, 0.0 }
 0x115   :  { %v543_v44 = vmax.f32 %v499_v41, 0.0  ;;  %v502_v45 = vadd.f32 %v709_v33, %v405_v42  ;;  %558 = vst.msk [vmem:[%s1038_s3 + $0x28] sm:$0xff] %vm318_vm0, %v542_v43  ;;  %v664_v46 = vpop.f32.mrb[16].mxu0  ;;  %v712_v47 = vpop.f32.mrb[16].mxu1 }
 0x116   :  { %v665_v49 = vpop.f32.mrb[17].mxu0  ;;  %v506_v50 = vpop.f32.mrb[17].mxu1 }
 0x117   :  { %559 = vst.msk [vmem:[%s1038_s3 + $0x30] sm:$0xff] %vm318_vm0, %v543_v44  ;;  %v544_v51 = vmax.f32 %v502_v45, 0.0  ;;  %v666_v52 = vadd.f32 %v665_v49, %v664_v46  ;;  %v667_v54 = vpop.f32.mrb[18].mxu0  ;;  %v713_v55 = vpop.f32.mrb[18].mxu1 }
 0x118   :  { %v668_v56 = vpop.f32.mrb[19].mxu0  ;;  %v509_v57 = vpop.f32.mrb[19].mxu1 }
 0x119   :  { %560 = vst.msk [vmem:[%s1038_s3 + $0x38] sm:$0xff] %vm318_vm0, %v544_v51  ;;  %v410_v58 = vadd.f32 %v666_v52, %v949_v2  ;;  %v669_v59 = vadd.f32 %v668_v56, %v667_v54 }
 0x11b   :  { %v507_v61 = vadd.f32 %v506_v50, %v410_v58  ;;  %v413_v62 = vadd.f32 %v669_v59, %v949_v2 }
 0x11d   :  { %v545_v0 = vmax.f32 %v507_v61, 0.0  ;;  %v510_v3 = vadd.f32 %v509_v57, %v413_v62  ;;  %v670_v4 = vpop.f32.mrb[20].mxu0  ;;  %v716_v5 = vpop.f32.mrb[20].mxu1 }
 0x11e   :  { %v531_v7 = vadd.f32 %v716_v5, %v434_v63  ;;  %v671_v8 = vpop.f32.mrb[21].mxu0  ;;  %v522_v9 = vpop.f32.mrb[21].mxu1 }
 0x11f   :  { %561 = vst.msk [vmem:[%s1038_s3 + $0x40] sm:$0xff] %vm318_vm0, %v545_v0  ;;  %v546_v11 = vmax.f32 %v510_v3, 0.0  ;;  %v672_v60 = vadd.f32 %v671_v8, %v670_v4  ;;  %v523_v12 = vadd.f32 %v522_v9, %v426_v6  ;;  %v673_v13 = vpop.f32.mrb[22].mxu0  ;;  %v717_v14 = vpop.f32.mrb[22].mxu1 }
 0x120   :  { %v551_v48 = vmax.f32 %v531_v7, 0.0  ;;  %v534_v16 = vadd.f32 %v717_v14, %v437_v10  ;;  %v674_v17 = vpop.f32.mrb[23].mxu0  ;;  %v525_v18 = vpop.f32.mrb[23].mxu1 }
 0x121   :  { %562 = vst.msk [vmem:[%s1038_s3 + $0x48] sm:$0xff] %vm318_vm0, %v546_v11  ;;  %v418_v1 = vadd.f32 %v672_v60, %v949_v2  ;;  %v549_v19 = vmax.f32 %v523_v12, 0.0  ;;  %v675_v20 = vadd.f32 %v674_v17, %v673_v13  ;;  %v526_v21 = vadd.f32 %v525_v18, %v429_v15 }
 0x122   :  { %567 = vst.msk [vmem:[%s1038_s3 + $0x70] sm:$0xff] %vm318_vm0, %v551_v48  ;;  %v552_v53 = vmax.f32 %v534_v16, 0.0 }
 0x123   :  { %v515_v22 = vadd.f32 %v712_v47, %v418_v1  ;;  %565 = vst.msk [vmem:[%s1038_s3 + $0x60] sm:$0xff] %vm318_vm0, %v549_v19  ;;  %v421_v23 = vadd.f32 %v675_v20, %v949_v2  ;;  %v550_v24 = vmax.f32 %v526_v21, 0.0 }
 0x124   :  { %568 = vst.msk [vmem:[%s1038_s3 + $0x78] sm:$0xff] %vm318_vm0, %v552_v53 }
 0x125   :  { %v547_v25 = vmax.f32 %v515_v22, 0.0  ;;  %v518_v26 = vadd.f32 %v713_v55, %v421_v23  ;;  %566 = vst.msk [vmem:[%s1038_s3 + $0x68] sm:$0xff] %vm318_vm0, %v550_v24 }
 0x127   :  { %563 = vst.msk [vmem:[%s1038_s3 + $0x50] sm:$0xff] %vm318_vm0, %v547_v25  ;;  %v548_v27 = vmax.f32 %v518_v26, 0.0 }
 0x129   :  { %564 = vst.msk [vmem:[%s1038_s3 + $0x58] sm:$0xff] %vm318_vm0, %v548_v27 }

// kernel: scnet_forward.14
= control target key start
LH: loop header
LB: loop body
LE: loop exit
PB: predicated region body
PF: predicated region fallthrough
CT: control target
= control target key end

     0   :  { %v147_v0 = vmov 0.0   ;;  %vm148_vm0 = vmmov 0   ;;  %vm63_vm1 = vcmask 1043456   ;;  %vm59_vm2 = vcmask 588800   ;;  %s193_s1 = inlined_call_operand.vmem [shape: bf16[72,8], index: 1, kind: input, shape index: {}]   ;;  %s194_s0 = inlined_call_operand.vmem [shape: bf16[8,72], index: 0, kind: input, shape index: {}]   ;;  %s195_s2 = inlined_call_operand.vmem [shape: f32[1,8], index: 2, kind: input, shape index: {}]   ;;  %s196_s3 = inlined_call_operand.vmem [shape: f32[8,8], index: 3, kind: output, shape index: {}]  }
   0x1   :  { %126 = vmatprep.subr.bf16.mxu0 %v147_v0  ;;  %v142_v1 = vld [vmem:[%s193_s1] sm:$0xff]   ;;  %136 = vmatprep.mubr.msk.bf16.mxu0 %vm148_vm0, %v147_v0  ;;  %v143_v2 = vld [vmem:[%s193_s1 + $0x8] sm:$0xff]   ;;  %v144_v3 = vld [vmem:[%s193_s1 + $0x10] sm:$0xff]   ;;  %vm107_vm3 = vcmask 64512  }
   0x2   :  { %127 = vmatpush3.bf16.msra.mxu0 %v142_v1  ;;  %v145_v4 = vld [vmem:[%s193_s1 + $0x18] sm:$0xff]   ;;  %v146_v5 = vld [vmem:[%s193_s1 + $0x20] ss:$0 sps:$4 sm:$0xff]  }
   0x3   :  { %128 = vmatprep.subr.bf16.mxu0 %v147_v0  ;;  %v65_v6 = vsel %vm63_vm1, %v146_v5, 0  ;;  %v15_v7 = vld [vmem:[%s194_s0] sm:$0xf] }
   0x4   :  { %v113_v8 = vld [vmem:[%s195_s2] ss:$0 sm:$0xff] }
   0x6   :  { %129 = vmatpush3.bf16.msra.mxu0 %v143_v2 }
   0x7   :  { %130 = vmatprep.subr.bf16.mxu0 %v147_v0 }
   0xa   :  { %131 = vmatpush3.bf16.msra.mxu0 %v144_v3 }
   0xb   :  { %132 = vmatprep.subr.bf16.mxu0 %v147_v0 }
   0xe   :  { %133 = vmatpush3.bf16.msra.mxu0 %v145_v4 }
   0xf   :  { %134 = vmatprep.subr.bf16.mxu0 %v147_v0 }
  0x12   :  { %135 = vmatpush3.bf16.msra.mxu0 %v65_v6 }
  0x15   :  { %137 = vmatmul.mubr.msk.bf16.vlgmr.msra.gmra.mrb[0].mxu0 %vm59_vm2, %v15_v7 }
  0xe8   :  { %v101_v9 = vpop.f32.mrb[0].mxu0 }
  0xe9   :  { %v102_v10 = vadd.f32 %v113_v8, %v101_v9  ;;  %v138_v11 = vpop.f32.mrb[1].mxu0 }
  0xea   :  { %v104_v12 = vpop.f32.mrb[2].mxu0 }
  0xeb   :  { %108 = vst.msk [vmem:[%s196_s3] sm:$0xff] %vm107_vm3, %v102_v10  ;;  %v139_v13 = vpop.f32.mrb[3].mxu0 }

// kernel: scnet_forward.16
= control target key start
LH: loop header
LB: loop body
LE: loop exit
PB: predicated region body
PF: predicated region fallthrough
CT: control target
= control target key end

     0   :  { %vm114_vm0 = vcmask 588800   ;;  %vm139_vm1 = vcmask 1043456   ;;  %vm256_vm2 = vcmask 64512   ;;  %s497_s1 = inlined_call_operand.vmem [shape: bf16[72,8], index: 1, kind: input, shape index: {}]   ;;  %s498_s0 = inlined_call_operand.vmem [shape: bf16[128,72], index: 0, kind: input, shape index: {}]   ;;  %s499_s2 = inlined_call_operand.vmem [shape: f32[1,8], index: 2, kind: input, shape index: {}]   ;;  %s500_s3 = inlined_call_operand.vmem [shape: f32[128,8], index: 3, kind: output, shape index: {}]  }
   0x1   :  { %v350_v0 = vld [vmem:[%s497_s1] sm:$0xff]   ;;  %v351_v1 = vld [vmem:[%s497_s1 + $0x8] sm:$0xff]   ;;  %v352_v2 = vld [vmem:[%s497_s1 + $0x10] sm:$0xff]  }
   0x2   :  { %312 = vmatprep.subr.bf16.mxu0 %v350_v0  ;;  %338 = vmatprep.subr.bf16.mxu1 %v350_v0  ;;  %v355_v3 = vld [vmem:[%s498_s0] sm:$0xff]   ;;  %v353_v5 = vld [vmem:[%s497_s1 + $0x18] sm:$0xff]   ;;  %v357_v8 = vld [vmem:[%s498_s0 + $0x8] sm:$0xff]  }
   0x3   :  { %313 = vmatpush3.bf16.msra.mxu0 %v350_v0  ;;  %343 = vmatpush3.bf16.msra.mxu1 %v350_v0  ;;  %v356_v4 = vld [vmem:[%s498_s0 + $0x20] sm:$0xff]   ;;  %v358_v9 = vld [vmem:[%s498_s0 + $0x28] sm:$0xff]   ;;  %v359_v10 = vld [vmem:[%s498_s0 + $0x10] sm:$0xff]  }
   0x4   :  { %314 = vmatprep.subr.bf16.mxu0 %v351_v1  ;;  %339 = vmatprep.subr.bf16.mxu1 %v351_v1  ;;  %v354_v6 = vld [vmem:[%s497_s1 + $0x20] ss:$0 sps:$4 sm:$0xff]   ;;  %v360_v11 = vld [vmem:[%s498_s0 + $0x30] sm:$0xff]   ;;  %v361_v12 = vld [vmem:[%s498_s0 + $0x18] sm:$0xff]  }
   0x5   :  { %322 = vmatprep.mubr.msk.bf16.mxu0 %vm114_vm0, %v355_v3  ;;  %330 = vmatprep.mubr.msk.bf16.mxu1 %vm114_vm0, %v356_v4  ;;  %v141_v7 = vsel %vm139_vm1, %v354_v6, 0  ;;  %v362_v13 = vld [vmem:[%s498_s0 + $0x38] sm:$0xff]   ;;  %v277_v14 = vld [vmem:[%s499_s2] ss:$0 sm:$0xff] }
   0x7   :  { %315 = vmatpush3.bf16.msra.mxu0 %v351_v1  ;;  %344 = vmatpush3.bf16.msra.mxu1 %v351_v1 }
   0x8   :  { %316 = vmatprep.subr.bf16.mxu0 %v352_v2  ;;  %340 = vmatprep.subr.bf16.mxu1 %v352_v2 }
   0xb   :  { %317 = vmatpush3.bf16.msra.mxu0 %v352_v2  ;;  %345 = vmatpush3.bf16.msra.mxu1 %v352_v2 }
   0xc   :  { %318 = vmatprep.subr.bf16.mxu0 %v353_v5  ;;  %341 = vmatprep.subr.bf16.mxu1 %v353_v5 }
   0xf   :  { %319 = vmatpush3.bf16.msra.mxu0 %v353_v5  ;;  %346 = vmatpush3.bf16.msra.mxu1 %v353_v5 }
  0x10   :  { %348 = vmatprep.subr.msk.bf16.mxu0 %vm139_vm1, %v354_v6  ;;  %349 = vmatprep.subr.msk.bf16.mxu1 %vm139_vm1, %v354_v6 }
  0x13   :  { %321 = vmatpush3.bf16.msra.mxu0 %v141_v7  ;;  %347 = vmatpush3.bf16.msra.mxu1 %v141_v7 }
  0x16   :  { %323 = vmatmul.mubr.msk.bf16.vlgmr.msra.gmra.mrb[0].mxu0 %vm114_vm0, %v357_v8  ;;  %331 = vmatmul.mubr.msk.bf16.vlgmr.msra.gmra.mrb[0].mxu1 %vm114_vm0, %v358_v9 }
  0x17   :  { %326 = vmatprep.mubr.msk.bf16.mxu0 %vm114_vm0, %v359_v10  ;;  %334 = vmatprep.mubr.msk.bf16.mxu1 %vm114_vm0, %v360_v11 }
  0x1e   :  { %327 = vmatmul.mubr.msk.bf16.gmra.mrb[4].mxu0 %vm114_vm0, %v361_v12  ;;  %335 = vmatmul.mubr.msk.bf16.gmra.mrb[4].mxu1 %vm114_vm0, %v362_v13 }
  0xe9   :  { %v324_v15 = vpop.f32.mrb[0].mxu0  ;;  %v332_v16 = vpop.f32.mrb[0].mxu1 }
  0xea   :  { %v186_v17 = vadd.f32 %v324_v15, %v277_v14  ;;  %v218_v18 = vadd.f32 %v332_v16, %v277_v14  ;;  %v177_v19 = vpop.f32.mrb[1].mxu0  ;;  %v209_v20 = vpop.f32.mrb[1].mxu1 }
  0xeb   :  { %v178_v21 = vadd.f32 %v277_v14, %v177_v19  ;;  %v210_v22 = vadd.f32 %v277_v14, %v209_v20  ;;  %v325_v23 = vpop.f32.mrb[2].mxu0  ;;  %v333_v24 = vpop.f32.mrb[2].mxu1 }
  0xec   :  { %v242_v25 = vmax.f32 %v186_v17, 0.0  ;;  %v250_v26 = vmax.f32 %v218_v18, 0.0  ;;  %v189_v27 = vadd.f32 %v325_v23, %v277_v14  ;;  %v221_v28 = vadd.f32 %v333_v24, %v277_v14  ;;  %v180_v29 = vpop.f32.mrb[3].mxu0  ;;  %v212_v30 = vpop.f32.mrb[3].mxu1 }
  0xed   :  { %v240_v31 = vmax.f32 %v178_v21, 0.0  ;;  %v248_v32 = vmax.f32 %v210_v22, 0.0  ;;  %v181_v33 = vadd.f32 %v277_v14, %v180_v29  ;;  %v213_v34 = vadd.f32 %v277_v14, %v212_v30 }
  0xee   :  { %259 = vst.msk [vmem:[%s500_s3 + $0x10] sm:$0xff] %vm256_vm2, %v242_v25  ;;  %267 = vst.msk [vmem:[%s500_s3 + $0x50] sm:$0xff] %vm256_vm2, %v250_v26  ;;  %v243_v35 = vmax.f32 %v189_v27, 0.0  ;;  %v251_v36 = vmax.f32 %v221_v28, 0.0 }
  0xef   :  { %257 = vst.msk [vmem:[%s500_s3] sm:$0xff] %vm256_vm2, %v240_v31  ;;  %265 = vst.msk [vmem:[%s500_s3 + $0x40] sm:$0xff] %vm256_vm2, %v248_v32  ;;  %v241_v37 = vmax.f32 %v181_v33, 0.0  ;;  %v249_v38 = vmax.f32 %v213_v34, 0.0 }
  0xf0   :  { %260 = vst.msk [vmem:[%s500_s3 + $0x18] sm:$0xff] %vm256_vm2, %v243_v35  ;;  %268 = vst.msk [vmem:[%s500_s3 + $0x58] sm:$0xff] %vm256_vm2, %v251_v36 }
  0xf1   :  { %258 = vst.msk [vmem:[%s500_s3 + $0x8] sm:$0xff] %vm256_vm2, %v241_v37  ;;  %266 = vst.msk [vmem:[%s500_s3 + $0x48] sm:$0xff] %vm256_vm2, %v249_v38  ;;  %v328_v39 = vpop.f32.mrb[4].mxu0  ;;  %v336_v40 = vpop.f32.mrb[4].mxu1 }
  0xf2   :  { %v202_v41 = vadd.f32 %v328_v39, %v277_v14  ;;  %v234_v42 = vadd.f32 %v336_v40, %v277_v14  ;;  %v193_v43 = vpop.f32.mrb[5].mxu0  ;;  %v225_v44 = vpop.f32.mrb[5].mxu1 }
  0xf3   :  { %v194_v45 = vadd.f32 %v277_v14, %v193_v43  ;;  %v226_v46 = vadd.f32 %v277_v14, %v225_v44  ;;  %v329_v47 = vpop.f32.mrb[6].mxu0  ;;  %v337_v48 = vpop.f32.mrb[6].mxu1 }
  0xf4   :  { %v246_v49 = vmax.f32 %v202_v41, 0.0  ;;  %v254_v50 = vmax.f32 %v234_v42, 0.0  ;;  %v205_v51 = vadd.f32 %v329_v47, %v277_v14  ;;  %v237_v52 = vadd.f32 %v337_v48, %v277_v14  ;;  %v196_v53 = vpop.f32.mrb[7].mxu0  ;;  %v228_v54 = vpop.f32.mrb[7].mxu1 }
  0xf5   :  { %v244_v55 = vmax.f32 %v194_v45, 0.0  ;;  %v252_v56 = vmax.f32 %v226_v46, 0.0  ;;  %v197_v57 = vadd.f32 %v277_v14, %v196_v53  ;;  %v229_v58 = vadd.f32 %v277_v14, %v228_v54 }
  0xf6   :  { %263 = vst.msk [vmem:[%s500_s3 + $0x30] sm:$0xff] %vm256_vm2, %v246_v49  ;;  %271 = vst.msk [vmem:[%s500_s3 + $0x70] sm:$0xff] %vm256_vm2, %v254_v50  ;;  %v247_v59 = vmax.f32 %v205_v51, 0.0  ;;  %v255_v60 = vmax.f32 %v237_v52, 0.0 }
  0xf7   :  { %261 = vst.msk [vmem:[%s500_s3 + $0x20] sm:$0xff] %vm256_vm2, %v244_v55  ;;  %269 = vst.msk [vmem:[%s500_s3 + $0x60] sm:$0xff] %vm256_vm2, %v252_v56  ;;  %v245_v61 = vmax.f32 %v197_v57, 0.0  ;;  %v253_v62 = vmax.f32 %v229_v58, 0.0 }
  0xf8   :  { %264 = vst.msk [vmem:[%s500_s3 + $0x38] sm:$0xff] %vm256_vm2, %v247_v59  ;;  %272 = vst.msk [vmem:[%s500_s3 + $0x78] sm:$0xff] %vm256_vm2, %v255_v60 }
  0xf9   :  { %262 = vst.msk [vmem:[%s500_s3 + $0x28] sm:$0xff] %vm256_vm2, %v245_v61  ;;  %270 = vst.msk [vmem:[%s500_s3 + $0x68] sm:$0xff] %vm256_vm2, %v253_v62 }

// kernel: scnet_forward.15
= control target key start
LH: loop header
LB: loop body
LE: loop exit
PB: predicated region body
PF: predicated region fallthrough
CT: control target
= control target key end

     0   :  { %vm120_vm0 = vcmask 588800   ;;  %vm145_vm1 = vcmask 1043456   ;;  %vm390_vm2 = vcmask 64512   ;;  %s819_s1 = inlined_call_operand.vmem [shape: bf16[72,8], index: 1, kind: input, shape index: {}]   ;;  %s820_s0 = inlined_call_operand.vmem [shape: bf16[128,72], index: 0, kind: input, shape index: {}]   ;;  %s821_s3 = inlined_call_operand.vmem [shape: f32[128,8], index: 3, kind: input, shape index: {}]   ;;  %s822_s4 = inlined_call_operand.vmem [shape: f32[128,8], index: 4, kind: input, shape index: {}]   ;;  %s823_s2 = inlined_call_operand.vmem [shape: f32[1,8], index: 2, kind: input, shape index: {}]   ;;  %s824_s5 = inlined_call_operand.vmem [shape: f32[128,8], index: 5, kind: output, shape index: {}]  }
   0x1   :  { %v484_v0 = vld [vmem:[%s819_s1] sm:$0xff]   ;;  %v485_v1 = vld [vmem:[%s819_s1 + $0x8] sm:$0xff]   ;;  %v486_v2 = vld [vmem:[%s819_s1 + $0x10] sm:$0xff]  }
   0x2   :  { %446 = vmatprep.subr.bf16.mxu0 %v484_v0  ;;  %472 = vmatprep.subr.bf16.mxu1 %v484_v0  ;;  %v489_v3 = vld [vmem:[%s820_s0] sm:$0xff]   ;;  %v487_v5 = vld [vmem:[%s819_s1 + $0x18] sm:$0xff]   ;;  %v491_v8 = vld [vmem:[%s820_s0 + $0x8] sm:$0xff]  }
   0x3   :  { %447 = vmatpush3.bf16.msra.mxu0 %v484_v0  ;;  %477 = vmatpush3.bf16.msra.mxu1 %v484_v0  ;;  %v490_v4 = vld [vmem:[%s820_s0 + $0x20] sm:$0xff]   ;;  %v492_v9 = vld [vmem:[%s820_s0 + $0x28] sm:$0xff]   ;;  %v493_v10 = vld [vmem:[%s820_s0 + $0x10] sm:$0xff]  }
   0x4   :  { %448 = vmatprep.subr.bf16.mxu0 %v485_v1  ;;  %473 = vmatprep.subr.bf16.mxu1 %v485_v1  ;;  %v488_v6 = vld [vmem:[%s819_s1 + $0x20] ss:$0 sps:$4 sm:$0xff]   ;;  %v494_v11 = vld [vmem:[%s820_s0 + $0x30] sm:$0xff]   ;;  %v495_v12 = vld [vmem:[%s820_s0 + $0x18] sm:$0xff]  }
   0x5   :  { %456 = vmatprep.mubr.msk.bf16.mxu0 %vm120_vm0, %v489_v3  ;;  %464 = vmatprep.mubr.msk.bf16.mxu1 %vm120_vm0, %v490_v4  ;;  %v147_v7 = vsel %vm145_vm1, %v488_v6, 0  ;;  %v496_v13 = vld [vmem:[%s820_s0 + $0x38] sm:$0xff]   ;;  %v248_v14 = vld [vmem:[%s821_s3 + $0x10] sm:$0xff]  ;;  %v246_v18 = vld [vmem:[%s821_s3] sm:$0xff] }
   0x6   :  { %v264_v15 = vld [vmem:[%s822_s4 + $0x10] sm:$0xff]  ;;  %v262_v19 = vld [vmem:[%s822_s4] sm:$0xff]  ;;  %v249_v24 = vld [vmem:[%s821_s3 + $0x18] sm:$0xff] }
   0x7   :  { %449 = vmatpush3.bf16.msra.mxu0 %v485_v1  ;;  %478 = vmatpush3.bf16.msra.mxu1 %v485_v1  ;;  %v256_v16 = vld [vmem:[%s821_s3 + $0x50] sm:$0xff]  ;;  %v280_v20 = vadd.f32 %v264_v15, %v248_v14  ;;  %v254_v21 = vld [vmem:[%s821_s3 + $0x40] sm:$0xff]  ;;  %v265_v25 = vld [vmem:[%s822_s4 + $0x18] sm:$0xff]  ;;  %v278_v26 = vadd.f32 %v262_v19, %v246_v18 }
   0x8   :  { %450 = vmatprep.subr.bf16.mxu0 %v486_v2  ;;  %474 = vmatprep.subr.bf16.mxu1 %v486_v2  ;;  %v272_v17 = vld [vmem:[%s822_s4 + $0x50] sm:$0xff]  ;;  %v270_v22 = vld [vmem:[%s822_s4 + $0x40] sm:$0xff]  ;;  %v257_v27 = vld [vmem:[%s821_s3 + $0x58] sm:$0xff]  ;;  %v281_v33 = vadd.f32 %v265_v25, %v249_v24 }
   0x9   :  { %v288_v23 = vadd.f32 %v272_v17, %v256_v16  ;;  %v273_v28 = vld [vmem:[%s822_s4 + $0x58] sm:$0xff]  ;;  %v286_v29 = vadd.f32 %v270_v22, %v254_v21  ;;  %v247_v30 = vld [vmem:[%s821_s3 + $0x8] sm:$0xff]  ;;  %v296_v32 = vsub.f32 0.0, %v280_v20  ;;  %v252_v38 = vld [vmem:[%s821_s3 + $0x30] sm:$0xff]  ;;  %v294_v40 = vsub.f32 0.0, %v278_v26 }
   0xa   :  { %v263_v31 = vld [vmem:[%s822_s4 + $0x8] sm:$0xff]  ;;  %v289_v37 = vadd.f32 %v273_v28, %v257_v27  ;;  %v268_v39 = vld [vmem:[%s822_s4 + $0x30] sm:$0xff]  ;;  %v250_v46 = vld [vmem:[%s821_s3 + $0x20] sm:$0xff]  ;;  %v297_v49 = vsub.f32 0.0, %v281_v33 }
   0xb   :  { %451 = vmatpush3.bf16.msra.mxu0 %v486_v2  ;;  %479 = vmatpush3.bf16.msra.mxu1 %v486_v2  ;;  %v255_v34 = vld [vmem:[%s821_s3 + $0x48] sm:$0xff]  ;;  %v304_v36 = vsub.f32 0.0, %v288_v23  ;;  %v279_v41 = vadd.f32 %v263_v31, %v247_v30  ;;  %v260_v42 = vld [vmem:[%s821_s3 + $0x70] sm:$0xff]  ;;  %v302_v44 = vsub.f32 0.0, %v286_v29  ;;  %v266_v47 = vld [vmem:[%s822_s4 + $0x20] sm:$0xff]  ;;  %v284_v50 = vadd.f32 %v268_v39, %v252_v38 }
   0xc   :  { %452 = vmatprep.subr.bf16.mxu0 %v487_v5  ;;  %475 = vmatprep.subr.bf16.mxu1 %v487_v5  ;;  %v271_v35 = vld [vmem:[%s822_s4 + $0x48] sm:$0xff]  ;;  %v276_v43 = vld [vmem:[%s822_s4 + $0x70] sm:$0xff]  ;;  %v314_v48 = vmul.f32 1.442695, %v296_v32  ;;  %v258_v51 = vld [vmem:[%s821_s3 + $0x60] sm:$0xff]  ;;  %v305_v54 = vsub.f32 0.0, %v289_v37  ;;  %v282_v60 = vadd.f32 %v266_v47, %v250_v46 }
   0xd   :  { %v287_v45 = vadd.f32 %v271_v35, %v255_v34  ;;  %v274_v52 = vld [vmem:[%s822_s4 + $0x60] sm:$0xff]  ;;  %v330_v53 = vmul.f32 1.442695, %v304_v36  ;;  %v292_v55 = vadd.f32 %v276_v43, %v260_v42  ;;  %v253_v56 = vld [vmem:[%s821_s3 + $0x38] sm:$0xff]  ;;  %v310_v58 = vmul.f32 1.442695, %v294_v40 }
   0xe   :  { %v269_v57 = vld [vmem:[%s822_s4 + $0x38] sm:$0xff]  ;;  %v295_v59 = vsub.f32 0.0, %v279_v41  ;;  %v326_v63 = vmul.f32 1.442695, %v302_v44  ;;  %v290_v1 = vadd.f32 %v274_v52, %v258_v51  ;;  %v251_v2 = vld [vmem:[%s821_s3 + $0x28] sm:$0xff]  ;;  %497 = vpow2.f32 %v314_v48 }
   0xf   :  { %453 = vmatpush3.bf16.msra.mxu0 %v487_v5  ;;  %480 = vmatpush3.bf16.msra.mxu1 %v487_v5  ;;  %v261_v61 = vld [vmem:[%s821_s3 + $0x78] sm:$0xff]  ;;  %v303_v0 = vsub.f32 0.0, %v287_v45  ;;  %v267_v3 = vld [vmem:[%s822_s4 + $0x28] sm:$0xff]  ;;  %v316_v4 = vmul.f32 1.442695, %v297_v49  ;;  %v300_v5 = vsub.f32 0.0, %v284_v50  ;;  %499 = vpow2.f32 %v330_v53 }
  0x10   :  { %482 = vmatprep.subr.msk.bf16.mxu0 %vm145_vm1, %v488_v6  ;;  %483 = vmatprep.subr.msk.bf16.mxu1 %vm145_vm1, %v488_v6  ;;  %v277_v62 = vld [vmem:[%s822_s4 + $0x78] sm:$0xff]  ;;  %v285_v6 = vadd.f32 %v269_v57, %v253_v56  ;;  %501 = vpow2.f32 %v310_v58  ;;  %v283_v14 = vadd.f32 %v267_v3, %v251_v2  ;;  %v306_v16 = vsub.f32 0.0, %v290_v1  ;;  %v737_v1 = vld [vmem:[%s823_s2] ss:$0 sm:$0xff] }
  0x11   :  { %503 = vpow2.f32 %v326_v63  ;;  %v328_v15 = vmul.f32 1.442695, %v303_v0  ;;  %v322_v18 = vmul.f32 1.442695, %v300_v5 }
  0x12   :  { %505 = vpow2.f32 %v316_v4  ;;  %v301_v19 = vsub.f32 0.0, %v285_v6  ;;  %v299_v23 = vsub.f32 0.0, %v283_v14  ;;  %v334_v24 = vmul.f32 1.442695, %v306_v16 }
  0x13   :  { %455 = vmatpush3.bf16.msra.mxu0 %v147_v7  ;;  %481 = vmatpush3.bf16.msra.mxu1 %v147_v7  ;;  %v259_v7 = vld [vmem:[%s821_s3 + $0x68] sm:$0xff] }
  0x14   :  { %v324_v26 = vmul.f32 1.442695, %v301_v19  ;;  %v320_v29 = vmul.f32 1.442695, %v299_v23 }
  0x16   :  { %457 = vmatmul.mubr.msk.bf16.vlgmr.msra.gmra.mrb[0].mxu0 %vm120_vm0, %v491_v8  ;;  %465 = vmatmul.mubr.msk.bf16.vlgmr.msra.gmra.mrb[0].mxu1 %vm120_vm0, %v492_v9  ;;  %v275_v8 = vld [vmem:[%s822_s4 + $0x68] sm:$0xff]  ;;  %v332_v9 = vmul.f32 1.442695, %v305_v54 }
  0x17   :  { %460 = vmatprep.mubr.msk.bf16.mxu0 %vm120_vm0, %v493_v10  ;;  %468 = vmatprep.mubr.msk.bf16.mxu1 %vm120_vm0, %v494_v11  ;;  %v308_v10 = vsub.f32 0.0, %v292_v55  ;;  %v293_v11 = vadd.f32 %v277_v62, %v261_v61  ;;  %v291_v17 = vadd.f32 %v275_v8, %v259_v7 }
  0x18   :  { %507 = vpow2.f32 %v332_v9  ;;  %v498_v28 = vpop.eup %497 }
  0x19   :  { %v338_v20 = vmul.f32 1.442695, %v308_v10  ;;  %v309_v21 = vsub.f32 0.0, %v293_v11  ;;  %v307_v25 = vsub.f32 0.0, %v291_v17  ;;  %v500_v30 = vpop.eup %499  ;;  %v344_v34 = vadd.f32 1.0, %v498_v28 }
  0x1a   :  { %v502_v32 = vpop.eup %501  ;;  %v352_v36 = vadd.f32 1.0, %v500_v30 }
  0x1b   :  { %v340_v27 = vmul.f32 1.442695, %v309_v21  ;;  %v336_v31 = vmul.f32 1.442695, %v307_v25  ;;  %v504_v33 = vpop.eup %503  ;;  %v342_v38 = vadd.f32 1.0, %v502_v32 }
  0x1c   :  { %v506_v35 = vpop.eup %505  ;;  %v350_v40 = vadd.f32 1.0, %v504_v33 }
  0x1d   :  { %v345_v42 = vadd.f32 1.0, %v506_v35 }
  0x1e   :  { %461 = vmatmul.mubr.msk.bf16.gmra.mrb[4].mxu0 %vm120_vm0, %v495_v12  ;;  %469 = vmatmul.mubr.msk.bf16.gmra.mrb[4].mxu1 %vm120_vm0, %v496_v13  ;;  %v312_v12 = vmul.f32 1.442695, %v295_v59  ;;  %v298_v13 = vsub.f32 0.0, %v282_v60 }
  0x20   :  { %509 = vpow2.f32 %v312_v12  ;;  %v318_v22 = vmul.f32 1.442695, %v298_v13 }
  0x21   :  { %511 = vpow2.f32 %v328_v15 }
  0x22   :  { %513 = vpow2.f32 %v322_v18  ;;  %v508_v37 = vpop.eup %507 }
  0x23   :  { %515 = vpow2.f32 %v338_v20  ;;  %v353_v44 = vadd.f32 1.0, %v508_v37 }
  0x24   :  { %517 = vpow2.f32 %v318_v22 }
  0x25   :  { %519 = vpow2.f32 %v334_v24 }
  0x26   :  { %521 = vpow2.f32 %v324_v26 }
  0x27   :  { %523 = vpow2.f32 %v340_v27 }
  0x28   :  { %525 = vpow2.f32 %v320_v29 }
  0x29   :  { %527 = vpow2.f32 %v336_v31 }
  0x2a   :  { %v510_v39 = vpop.eup %509  ;;  %529 = vrcp.f32 %v344_v34 }
  0x2b   :  { %v512_v41 = vpop.eup %511  ;;  %531 = vrcp.f32 %v352_v36  ;;  %v343_v46 = vadd.f32 1.0, %v510_v39 }
  0x2c   :  { %v514_v43 = vpop.eup %513  ;;  %533 = vrcp.f32 %v342_v38  ;;  %v351_v48 = vadd.f32 1.0, %v512_v41 }
  0x2d   :  { %v516_v45 = vpop.eup %515  ;;  %535 = vrcp.f32 %v350_v40  ;;  %v348_v50 = vadd.f32 1.0, %v514_v43 }
  0x2e   :  { %v518_v47 = vpop.eup %517  ;;  %537 = vrcp.f32 %v345_v42  ;;  %v356_v52 = vadd.f32 1.0, %v516_v45 }
  0x2f   :  { %v520_v49 = vpop.eup %519  ;;  %539 = vrcp.f32 %v353_v44  ;;  %v346_v54 = vadd.f32 1.0, %v518_v47 }
  0x30   :  { %v522_v51 = vpop.eup %521  ;;  %541 = vrcp.f32 %v343_v46  ;;  %v354_v56 = vadd.f32 1.0, %v520_v49 }
  0x31   :  { %v524_v53 = vpop.eup %523  ;;  %543 = vrcp.f32 %v351_v48  ;;  %v349_v58 = vadd.f32 1.0, %v522_v51 }
  0x32   :  { %v526_v55 = vpop.eup %525  ;;  %545 = vrcp.f32 %v348_v50  ;;  %v357_v59 = vadd.f32 1.0, %v524_v53 }
  0x33   :  { %v528_v57 = vpop.eup %527  ;;  %547 = vrcp.f32 %v356_v52  ;;  %v347_v61 = vadd.f32 1.0, %v526_v55 }
  0x34   :  { %v530_v60 = vpop.eup %529  ;;  %549 = vrcp.f32 %v346_v54  ;;  %v355_v63 = vadd.f32 1.0, %v528_v57 }
  0x35   :  { %v532_v62 = vpop.eup %531  ;;  %551 = vrcp.f32 %v354_v56 }
  0x36   :  { %v534_v0 = vpop.eup %533  ;;  %553 = vrcp.f32 %v349_v58 }
  0x37   :  { %v536_v2 = vpop.eup %535  ;;  %555 = vrcp.f32 %v357_v59 }
  0x38   :  { %v538_v3 = vpop.eup %537  ;;  %557 = vrcp.f32 %v347_v61 }
  0x39   :  { %v540_v6 = vpop.eup %539  ;;  %559 = vrcp.f32 %v355_v63 }
  0x3a   :  { %v542_v11 = vpop.eup %541 }
  0x3b   :  { %v544_v16 = vpop.eup %543 }
  0x3c   :  { %v546_v23 = vpop.eup %545 }
  0x3d   :  { %v548_v28 = vpop.eup %547 }
  0x3e   :  { %v550_v31 = vpop.eup %549 }
  0x3f   :  { %v552_v34 = vpop.eup %551 }
  0x40   :  { %v554_v35 = vpop.eup %553 }
  0x41   :  { %v556_v38 = vpop.eup %555 }
  0x42   :  { %v558_v43 = vpop.eup %557 }
  0x43   :  { %v560_v48 = vpop.eup %559 }
  0xe9   :  { %v458_v4 = vpop.f32.mrb[0].mxu0  ;;  %v466_v5 = vpop.f32.mrb[0].mxu1 }
  0xea   :  { %v192_v7 = vadd.f32 %v458_v4, %v737_v1  ;;  %v224_v8 = vadd.f32 %v466_v5, %v737_v1  ;;  %v183_v9 = vpop.f32.mrb[1].mxu0  ;;  %v215_v10 = vpop.f32.mrb[1].mxu1 }
  0xeb   :  { %v184_v12 = vadd.f32 %v737_v1, %v183_v9  ;;  %v216_v13 = vadd.f32 %v737_v1, %v215_v10  ;;  %v459_v14 = vpop.f32.mrb[2].mxu0  ;;  %v467_v15 = vpop.f32.mrb[2].mxu1 }
  0xec   :  { %v376_v17 = vmul.f32 %v530_v60, %v192_v7  ;;  %v384_v18 = vmul.f32 %v532_v62, %v224_v8  ;;  %v195_v19 = vadd.f32 %v459_v14, %v737_v1  ;;  %v227_v20 = vadd.f32 %v467_v15, %v737_v1  ;;  %v186_v21 = vpop.f32.mrb[3].mxu0  ;;  %v218_v22 = vpop.f32.mrb[3].mxu1 }
  0xed   :  { %v374_v24 = vmul.f32 %v534_v0, %v184_v12  ;;  %v382_v25 = vmul.f32 %v536_v2, %v216_v13  ;;  %v187_v26 = vadd.f32 %v737_v1, %v186_v21  ;;  %v219_v27 = vadd.f32 %v737_v1, %v218_v22 }
  0xee   :  { %393 = vst.msk [vmem:[%s824_s5 + $0x10] sm:$0xff] %vm390_vm2, %v376_v17  ;;  %401 = vst.msk [vmem:[%s824_s5 + $0x50] sm:$0xff] %vm390_vm2, %v384_v18  ;;  %v377_v29 = vmul.f32 %v538_v3, %v195_v19  ;;  %v385_v30 = vmul.f32 %v540_v6, %v227_v20 }
  0xef   :  { %391 = vst.msk [vmem:[%s824_s5] sm:$0xff] %vm390_vm2, %v374_v24  ;;  %399 = vst.msk [vmem:[%s824_s5 + $0x40] sm:$0xff] %vm390_vm2, %v382_v25  ;;  %v375_v32 = vmul.f32 %v542_v11, %v187_v26  ;;  %v383_v33 = vmul.f32 %v544_v16, %v219_v27 }
  0xf0   :  { %394 = vst.msk [vmem:[%s824_s5 + $0x18] sm:$0xff] %vm390_vm2, %v377_v29  ;;  %402 = vst.msk [vmem:[%s824_s5 + $0x58] sm:$0xff] %vm390_vm2, %v385_v30 }
  0xf1   :  { %392 = vst.msk [vmem:[%s824_s5 + $0x8] sm:$0xff] %vm390_vm2, %v375_v32  ;;  %400 = vst.msk [vmem:[%s824_s5 + $0x48] sm:$0xff] %vm390_vm2, %v383_v33  ;;  %v462_v36 = vpop.f32.mrb[4].mxu0  ;;  %v470_v37 = vpop.f32.mrb[4].mxu1 }
  0xf2   :  { %v208_v39 = vadd.f32 %v462_v36, %v737_v1  ;;  %v240_v40 = vadd.f32 %v470_v37, %v737_v1  ;;  %v199_v41 = vpop.f32.mrb[5].mxu0  ;;  %v231_v42 = vpop.f32.mrb[5].mxu1 }
  0xf3   :  { %v200_v44 = vadd.f32 %v737_v1, %v199_v41  ;;  %v232_v45 = vadd.f32 %v737_v1, %v231_v42  ;;  %v463_v46 = vpop.f32.mrb[6].mxu0  ;;  %v471_v47 = vpop.f32.mrb[6].mxu1 }
  0xf4   :  { %v380_v49 = vmul.f32 %v546_v23, %v208_v39  ;;  %v388_v50 = vmul.f32 %v548_v28, %v240_v40  ;;  %v211_v51 = vadd.f32 %v463_v46, %v737_v1  ;;  %v243_v52 = vadd.f32 %v471_v47, %v737_v1  ;;  %v202_v53 = vpop.f32.mrb[7].mxu0  ;;  %v234_v54 = vpop.f32.mrb[7].mxu1 }
  0xf5   :  { %v378_v55 = vmul.f32 %v550_v31, %v200_v44  ;;  %v386_v56 = vmul.f32 %v552_v34, %v232_v45  ;;  %v203_v57 = vadd.f32 %v737_v1, %v202_v53  ;;  %v235_v58 = vadd.f32 %v737_v1, %v234_v54 }
  0xf6   :  { %397 = vst.msk [vmem:[%s824_s5 + $0x30] sm:$0xff] %vm390_vm2, %v380_v49  ;;  %405 = vst.msk [vmem:[%s824_s5 + $0x70] sm:$0xff] %vm390_vm2, %v388_v50  ;;  %v381_v59 = vmul.f32 %v554_v35, %v211_v51  ;;  %v389_v60 = vmul.f32 %v556_v38, %v243_v52 }
  0xf7   :  { %395 = vst.msk [vmem:[%s824_s5 + $0x20] sm:$0xff] %vm390_vm2, %v378_v55  ;;  %403 = vst.msk [vmem:[%s824_s5 + $0x60] sm:$0xff] %vm390_vm2, %v386_v56  ;;  %v379_v61 = vmul.f32 %v558_v43, %v203_v57  ;;  %v387_v62 = vmul.f32 %v560_v48, %v235_v58 }
  0xf8   :  { %398 = vst.msk [vmem:[%s824_s5 + $0x38] sm:$0xff] %vm390_vm2, %v381_v59  ;;  %406 = vst.msk [vmem:[%s824_s5 + $0x78] sm:$0xff] %vm390_vm2, %v389_v60 }
  0xf9   :  { %396 = vst.msk [vmem:[%s824_s5 + $0x28] sm:$0xff] %vm390_vm2, %v379_v61  ;;  %404 = vst.msk [vmem:[%s824_s5 + $0x68] sm:$0xff] %vm390_vm2, %v387_v62 }

// kernel: scnet_forward.17
= control target key start
LH: loop header
LB: loop body
LE: loop exit
PB: predicated region body
PF: predicated region fallthrough
CT: control target
= control target key end

     0   :  { %vm107_vm0 = vcmask 1043456   ;;  %vm82_vm1 = vcmask 64512   ;;  %vm256_vm2 = vcmask 261120   ;;  %s526_s1 = inlined_call_operand.vmem [shape: bf16[8,32], index: 1, kind: input, shape index: {}]   ;;  %s527_s0 = inlined_call_operand.vmem [shape: bf16[128,8], index: 0, kind: input, shape index: {}]   ;;  %s528_s2 = inlined_call_operand.vmem [shape: f32[1,32], index: 2, kind: input, shape index: {}]   ;;  %s529_s3 = inlined_call_operand.vmem [shape: f32[128,32], index: 3, kind: input, shape index: {}]   ;;  %s530_s4 = inlined_call_operand.vmem [shape: f32[128,32], index: 4, kind: output, shape index: {}]  }
   0x1   :  { %v34_v0 = vld [vmem:[%s526_s1] sm:$0xf]  ;;  %v327_v4 = vld [vmem:[%s527_s0 + $0x8] sm:$0xff]   ;;  %v329_v6 = vld [vmem:[%s527_s0 + $0x10] sm:$0xff]  }
   0x2   :  { %323 = vmatprep.subr.msk.bf16.mxu0 %vm107_vm0, %v34_v0  ;;  %324 = vmatprep.subr.msk.bf16.mxu1 %vm107_vm0, %v34_v0  ;;  %v109_v1 = vsel %vm107_vm0, %v34_v0, 0  ;;  %v325_v2 = vld [vmem:[%s527_s0] sm:$0xff]   ;;  %v328_v5 = vld [vmem:[%s527_s0 + $0x28] sm:$0xff]   ;;  %v330_v7 = vld [vmem:[%s527_s0 + $0x30] sm:$0xff]  }
   0x3   :  { %304 = vmatpush3.bf16.msra.mxu0 %v109_v1  ;;  %322 = vmatpush3.bf16.msra.mxu1 %v109_v1  ;;  %v326_v3 = vld [vmem:[%s527_s0 + $0x20] sm:$0xff]   ;;  %v331_v8 = vld [vmem:[%s527_s0 + $0x18] sm:$0xff]   ;;  %v210_v12 = vld [vmem:[%s529_s3 + $0x10] sm:$0xff] }
   0x4   :  { %305 = vmatprep.mubr.msk.bf16.mxu0 %vm82_vm1, %v325_v2  ;;  %313 = vmatprep.mubr.msk.bf16.mxu1 %vm82_vm1, %v326_v3  ;;  %v332_v9 = vld [vmem:[%s527_s0 + $0x38] sm:$0xff]   ;;  %v396_v10 = vld [vmem:[%s528_s2] ss:$0 sm:$0xff]  ;;  %v218_v15 = vld [vmem:[%s529_s3 + $0x50] sm:$0xff] }
   0x5   :  { %v208_v17 = vld [vmem:[%s529_s3] sm:$0xff]  ;;  %v211_v23 = vld [vmem:[%s529_s3 + $0x18] sm:$0xff]  ;;  %v209_v30 = vld [vmem:[%s529_s3 + $0x8] sm:$0xff] }
   0x6   :  { %306 = vmatmul.mubr.msk.bf16.vlgmr.msra.gmra.mrb[0].mxu0 %vm82_vm1, %v327_v4  ;;  %314 = vmatmul.mubr.msk.bf16.vlgmr.msra.gmra.mrb[0].mxu1 %vm82_vm1, %v328_v5  ;;  %v216_v21 = vld [vmem:[%s529_s3 + $0x40] sm:$0xff]  ;;  %v219_v28 = vld [vmem:[%s529_s3 + $0x58] sm:$0xff]  ;;  %v217_v36 = vld [vmem:[%s529_s3 + $0x48] sm:$0xff] }
   0x7   :  { %309 = vmatprep.mubr.msk.bf16.mxu0 %vm82_vm1, %v329_v6  ;;  %317 = vmatprep.mubr.msk.bf16.mxu1 %vm82_vm1, %v330_v7  ;;  %v214_v51 = vld [vmem:[%s529_s3 + $0x30] sm:$0xff]  ;;  %v212_v57 = vld [vmem:[%s529_s3 + $0x20] sm:$0xff]  ;;  %v215_v63 = vld [vmem:[%s529_s3 + $0x38] sm:$0xff] }
   0x8   :  { %v222_v55 = vld [vmem:[%s529_s3 + $0x70] sm:$0xff]  ;;  %v220_v61 = vld [vmem:[%s529_s3 + $0x60] sm:$0xff]  ;;  %v223_v4 = vld [vmem:[%s529_s3 + $0x78] sm:$0xff] }
   0x9   :  { %v213_v6 = vld [vmem:[%s529_s3 + $0x28] sm:$0xff] }
   0xe   :  { %310 = vmatmul.mubr.msk.bf16.gmra.mrb[4].mxu0 %vm82_vm1, %v331_v8  ;;  %318 = vmatmul.mubr.msk.bf16.gmra.mrb[4].mxu1 %vm82_vm1, %v332_v9 }
  0xd9   :  { %v307_v11 = vpop.f32.mrb[0].mxu0  ;;  %v315_v14 = vpop.f32.mrb[0].mxu1 }
  0xda   :  { %v154_v13 = vadd.f32 %v307_v11, %v396_v10  ;;  %v145_v16 = vpop.f32.mrb[1].mxu0  ;;  %v186_v18 = vadd.f32 %v315_v14, %v396_v10  ;;  %v177_v20 = vpop.f32.mrb[1].mxu1 }
  0xdb   :  { %v146_v19 = vadd.f32 %v396_v10, %v145_v16  ;;  %v308_v22 = vpop.f32.mrb[2].mxu0  ;;  %v178_v25 = vadd.f32 %v396_v10, %v177_v20  ;;  %v316_v27 = vpop.f32.mrb[2].mxu1 }
  0xdc   :  { %v226_v24 = vadd.f32 %v210_v12, %v154_v13  ;;  %v157_v26 = vadd.f32 %v308_v22, %v396_v10  ;;  %v148_v29 = vpop.f32.mrb[3].mxu0  ;;  %v234_v31 = vadd.f32 %v218_v15, %v186_v18  ;;  %v189_v33 = vadd.f32 %v316_v27, %v396_v10  ;;  %v180_v35 = vpop.f32.mrb[3].mxu1  ;;  %v221_v13 = vld [vmem:[%s529_s3 + $0x68] sm:$0xff] }
  0xdd   :  { %v224_v32 = vadd.f32 %v208_v17, %v146_v19  ;;  %v149_v34 = vadd.f32 %v396_v10, %v148_v29  ;;  %v232_v38 = vadd.f32 %v216_v21, %v178_v25  ;;  %v181_v40 = vadd.f32 %v396_v10, %v180_v35 }
  0xde   :  { %v242_v37 = vmax.f32 %v226_v24, 0.0  ;;  %v227_v39 = vadd.f32 %v211_v23, %v157_v26  ;;  %v250_v41 = vmax.f32 %v234_v31, 0.0  ;;  %v235_v43 = vadd.f32 %v219_v28, %v189_v33 }
  0xdf   :  { %v240_v42 = vmax.f32 %v224_v32, 0.0  ;;  %v225_v44 = vadd.f32 %v209_v30, %v149_v34  ;;  %v248_v45 = vmax.f32 %v232_v38, 0.0  ;;  %v233_v47 = vadd.f32 %v217_v36, %v181_v40 }
  0xe0   :  { %259 = vst.msk [vmem:[%s530_s4 + $0x10] sm:$0xff] %vm256_vm2, %v242_v37  ;;  %v243_v46 = vmax.f32 %v227_v39, 0.0  ;;  %267 = vst.msk [vmem:[%s530_s4 + $0x50] sm:$0xff] %vm256_vm2, %v250_v41  ;;  %v251_v48 = vmax.f32 %v235_v43, 0.0 }
  0xe1   :  { %257 = vst.msk [vmem:[%s530_s4] sm:$0xff] %vm256_vm2, %v240_v42  ;;  %v241_v49 = vmax.f32 %v225_v44, 0.0  ;;  %v311_v50 = vpop.f32.mrb[4].mxu0  ;;  %265 = vst.msk [vmem:[%s530_s4 + $0x40] sm:$0xff] %vm256_vm2, %v248_v45  ;;  %v249_v52 = vmax.f32 %v233_v47, 0.0  ;;  %v319_v54 = vpop.f32.mrb[4].mxu1 }
  0xe2   :  { %260 = vst.msk [vmem:[%s530_s4 + $0x18] sm:$0xff] %vm256_vm2, %v243_v46  ;;  %v170_v53 = vadd.f32 %v311_v50, %v396_v10  ;;  %v161_v56 = vpop.f32.mrb[5].mxu0  ;;  %268 = vst.msk [vmem:[%s530_s4 + $0x58] sm:$0xff] %vm256_vm2, %v251_v48  ;;  %v202_v58 = vadd.f32 %v319_v54, %v396_v10  ;;  %v193_v60 = vpop.f32.mrb[5].mxu1 }
  0xe3   :  { %258 = vst.msk [vmem:[%s530_s4 + $0x8] sm:$0xff] %vm256_vm2, %v241_v49  ;;  %v162_v59 = vadd.f32 %v396_v10, %v161_v56  ;;  %v312_v62 = vpop.f32.mrb[6].mxu0  ;;  %266 = vst.msk [vmem:[%s530_s4 + $0x48] sm:$0xff] %vm256_vm2, %v249_v52  ;;  %v194_v1 = vadd.f32 %v396_v10, %v193_v60  ;;  %v320_v3 = vpop.f32.mrb[6].mxu1 }
  0xe4   :  { %v230_v0 = vadd.f32 %v214_v51, %v170_v53  ;;  %v173_v2 = vadd.f32 %v312_v62, %v396_v10  ;;  %v164_v5 = vpop.f32.mrb[7].mxu0  ;;  %v238_v7 = vadd.f32 %v222_v55, %v202_v58  ;;  %v205_v9 = vadd.f32 %v320_v3, %v396_v10  ;;  %v196_v12 = vpop.f32.mrb[7].mxu1 }
  0xe5   :  { %v228_v8 = vadd.f32 %v212_v57, %v162_v59  ;;  %v165_v11 = vadd.f32 %v396_v10, %v164_v5  ;;  %v236_v15 = vadd.f32 %v220_v61, %v194_v1  ;;  %v197_v17 = vadd.f32 %v396_v10, %v196_v12 }
  0xe6   :  { %v246_v14 = vmax.f32 %v230_v0, 0.0  ;;  %v231_v16 = vadd.f32 %v215_v63, %v173_v2  ;;  %v254_v18 = vmax.f32 %v238_v7, 0.0  ;;  %v239_v20 = vadd.f32 %v223_v4, %v205_v9 }
  0xe7   :  { %v244_v19 = vmax.f32 %v228_v8, 0.0  ;;  %v229_v21 = vadd.f32 %v213_v6, %v165_v11  ;;  %v252_v22 = vmax.f32 %v236_v15, 0.0  ;;  %v237_v24 = vadd.f32 %v221_v13, %v197_v17 }
  0xe8   :  { %263 = vst.msk [vmem:[%s530_s4 + $0x30] sm:$0xff] %vm256_vm2, %v246_v14  ;;  %v247_v23 = vmax.f32 %v231_v16, 0.0  ;;  %271 = vst.msk [vmem:[%s530_s4 + $0x70] sm:$0xff] %vm256_vm2, %v254_v18  ;;  %v255_v10 = vmax.f32 %v239_v20, 0.0 }
  0xe9   :  { %261 = vst.msk [vmem:[%s530_s4 + $0x20] sm:$0xff] %vm256_vm2, %v244_v19  ;;  %v245_v25 = vmax.f32 %v229_v21, 0.0  ;;  %269 = vst.msk [vmem:[%s530_s4 + $0x60] sm:$0xff] %vm256_vm2, %v252_v22  ;;  %v253_v26 = vmax.f32 %v237_v24, 0.0 }
  0xea   :  { %264 = vst.msk [vmem:[%s530_s4 + $0x38] sm:$0xff] %vm256_vm2, %v247_v23  ;;  %272 = vst.msk [vmem:[%s530_s4 + $0x78] sm:$0xff] %vm256_vm2, %v255_v10 }
  0xeb   :  { %262 = vst.msk [vmem:[%s530_s4 + $0x28] sm:$0xff] %vm256_vm2, %v245_v25  ;;  %270 = vst.msk [vmem:[%s530_s4 + $0x68] sm:$0xff] %vm256_vm2, %v253_v26 }

// kernel: scnet_forward.19
= control target key start
LH: loop header
LB: loop body
LE: loop exit
PB: predicated region body
PF: predicated region fallthrough
CT: control target
= control target key end

     0   :  { %vm68_vm0 = vcmask 523264   ;;  %vm128_vm1 = vcmask 130048   ;;  %s223_s1 = inlined_call_operand.vmem [shape: bf16[64,16], index: 1, kind: input, shape index: {}]   ;;  %s224_s0 = inlined_call_operand.vmem [shape: bf16[32,64], index: 0, kind: input, shape index: {}]   ;;  %s225_s2 = inlined_call_operand.vmem [shape: f32[1,16], index: 2, kind: input, shape index: {}]   ;;  %s226_s3 = inlined_call_operand.vmem [shape: f32[32,16], index: 3, kind: output, shape index: {}]  }
   0x1   :  { %v164_v0 = vld [vmem:[%s223_s1] sm:$0xff]   ;;  %v165_v1 = vld [vmem:[%s223_s1 + $0x8] sm:$0xff]   ;;  %v166_v2 = vld [vmem:[%s223_s1 + $0x10] sm:$0xff]  }
   0x2   :  { %152 = vmatprep.subr.bf16.mxu0 %v164_v0  ;;  %v168_v3 = vld [vmem:[%s224_s0] sm:$0xff]   ;;  %v167_v4 = vld [vmem:[%s223_s1 + $0x18] sm:$0xff]   ;;  %v169_v5 = vld [vmem:[%s224_s0 + $0x8] sm:$0xff]  }
   0x3   :  { %153 = vmatpush3.bf16.msra.mxu0 %v164_v0  ;;  %160 = vmatprep.mubr.msk.bf16.mxu0 %vm68_vm0, %v168_v3  ;;  %v137_v6 = vld [vmem:[%s225_s2] ss:$0 sm:$0xff] }
   0x4   :  { %154 = vmatprep.subr.bf16.mxu0 %v165_v1 }
   0x7   :  { %155 = vmatpush3.bf16.msra.mxu0 %v165_v1 }
   0x8   :  { %156 = vmatprep.subr.bf16.mxu0 %v166_v2 }
   0xb   :  { %157 = vmatpush3.bf16.msra.mxu0 %v166_v2 }
   0xc   :  { %158 = vmatprep.subr.bf16.mxu0 %v167_v4 }
   0xf   :  { %159 = vmatpush3.bf16.msra.mxu0 %v167_v4 }
  0x12   :  { %161 = vmatmul.mubr.msk.bf16.vlgmr.msra.gmra.mrb[0].mxu0 %vm68_vm0, %v169_v5 }
  0xe5   :  { %v162_v7 = vpop.f32.mrb[0].mxu0 }
  0xe6   :  { %v118_v8 = vadd.f32 %v162_v7, %v137_v6  ;;  %v109_v9 = vpop.f32.mrb[1].mxu0 }
  0xe7   :  { %v110_v10 = vadd.f32 %v137_v6, %v109_v9  ;;  %v163_v11 = vpop.f32.mrb[2].mxu0 }
  0xe8   :  { %v126_v12 = vmax.f32 %v118_v8, 0.0  ;;  %v121_v13 = vadd.f32 %v163_v11, %v137_v6  ;;  %v112_v14 = vpop.f32.mrb[3].mxu0 }
  0xe9   :  { %v124_v15 = vmax.f32 %v110_v10, 0.0  ;;  %v113_v16 = vadd.f32 %v137_v6, %v112_v14 }
  0xea   :  { %131 = vst.msk [vmem:[%s226_s3 + $0x10] sm:$0xff] %vm128_vm1, %v126_v12  ;;  %v127_v17 = vmax.f32 %v121_v13, 0.0 }
  0xeb   :  { %129 = vst.msk [vmem:[%s226_s3] sm:$0xff] %vm128_vm1, %v124_v15  ;;  %v125_v18 = vmax.f32 %v113_v16, 0.0 }
  0xec   :  { %132 = vst.msk [vmem:[%s226_s3 + $0x18] sm:$0xff] %vm128_vm1, %v127_v17 }
  0xed   :  { %130 = vst.msk [vmem:[%s226_s3 + $0x8] sm:$0xff] %vm128_vm1, %v125_v18 }

// kernel: scnet_forward.18
= control target key start
LH: loop header
LB: loop body
LE: loop exit
PB: predicated region body
PF: predicated region fallthrough
CT: control target
= control target key end

     0   :  { %vm204_vm0 = vcmask 261120   ;;  %vm313_vm1 = vcmask 523264   ;;  %s526_s1 = inlined_call_operand.vmem [shape: bf16[288,64], index: 1, kind: input, shape index: {}]   ;;  %s527_s0 = inlined_call_operand.vmem [shape: bf16[32,288], index: 0, kind: input, shape index: {}]   ;;  %s528_s2 = inlined_call_operand.vmem [shape: f32[1,64], index: 2, kind: input, shape index: {}]   ;;  %s529_s3 = inlined_call_operand.vmem [shape: f32[32,64], index: 3, kind: output, shape index: {}]  }
   0x1   :  { %v389_v0 = vld [vmem:[%s526_s1 + $0x40] sm:$0xff]   ;;  %v391_v2 = vld [vmem:[%s526_s1 + $0x48] sm:$0xff]   ;;  %v393_v4 = vld [vmem:[%s526_s1 + $0x50] sm:$0xff]  }
   0x2   :  { %v390_v1 = vld [vmem:[%s526_s1] sm:$0xff]   ;;  %349 = vmatprep.subr.bf16.mxu0 %v389_v0  ;;  %v392_v3 = vld [vmem:[%s526_s1 + $0x8] sm:$0xff]   ;;  %v394_v5 = vld [vmem:[%s526_s1 + $0x10] sm:$0xff]  }
   0x3   :  { %350 = vmatpush3.bf16.msra.mxu0 %v390_v1  ;;  %v395_v6 = vld [vmem:[%s526_s1 + $0x58] sm:$0xff]   ;;  %v397_v8 = vld [vmem:[%s526_s1 + $0x60] sm:$0xff]   ;;  %v399_v11 = vld [vmem:[%s526_s1 + $0x68] sm:$0xff]  }
   0x4   :  { %351 = vmatprep.subr.bf16.mxu0 %v391_v2  ;;  %v396_v7 = vld [vmem:[%s526_s1 + $0x18] sm:$0xff]   ;;  %v398_v9 = vld [vmem:[%s526_s1 + $0x20] sm:$0xff]   ;;  %v400_v12 = vld [vmem:[%s526_s1 + $0x28] sm:$0xff]  }
   0x5   :  { %v404_v10 = vld [vmem:[%s526_s1 + $0x80] sm:$0xff]   ;;  %v401_v13 = vld [vmem:[%s526_s1 + $0x70] sm:$0xff]   ;;  %v409_v15 = vld [vmem:[%s526_s1 + $0x88] sm:$0xff]  }
   0x6   :  { %381 = vmatprep.subr.bf16.mxu1 %v404_v10  ;;  %v408_v14 = vld [vmem:[%s527_s0 + $0x4] ss:$12 sps:$4 sm:$0xff]   ;;  %v410_v16 = vld [vmem:[%s527_s0 + $0x8] ss:$12 sps:$4 sm:$0xff]   ;;  %v411_v17 = vld [vmem:[%s527_s0 + $0x20] ss:$12 sps:$4 sm:$0xff]  }
   0x7   :  { %352 = vmatpush3.bf16.msra.mxu0 %v392_v3  ;;  %382 = vmatpush3.bf16.msra.mxu1 %v404_v10  ;;  %v402_v18 = vld [vmem:[%s526_s1 + $0x30] sm:$0xff]   ;;  %v403_v19 = vld [vmem:[%s526_s1 + $0x78] sm:$0xff]   ;;  %v406_v21 = vld [vmem:[%s527_s0] ss:$12 sps:$4 sm:$0xff]  }
   0x8   :  { %353 = vmatprep.subr.bf16.mxu0 %v393_v4  ;;  %243 = vmatprep.mubr.bf16.mxu0 %v408_v14  ;;  %v405_v20 = vld [vmem:[%s526_s1 + $0x38] sm:$0xff]   ;;  %v322_v30 = vld [vmem:[%s528_s2] ss:$0 sm:$0xff] }
   0x9   :  { %383 = vmatprep.subr.bf16.mxu1 %v409_v15  ;;  %385 = vmatprep.mubr.msk.bf16.mxu1 %vm204_vm0, %v410_v16  ;;  %v412_v22 = vld [vmem:[%s527_s0 + $0x1c] ss:$12 sps:$4 sm:$0xff]   ;;  %v414_v23 = vld [vmem:[%s527_s0 + $0x18] ss:$12 sps:$4 sm:$0xff]  }
   0xb   :  { %354 = vmatpush3.bf16.msra.mxu0 %v394_v5  ;;  %384 = vmatpush3.bf16.msra.mxu1 %v409_v15 }
   0xc   :  { %355 = vmatprep.subr.bf16.mxu0 %v395_v6 }
   0xe   :  { %386 = vmatmul.mubr.msk.bf16.vlgmr.msra.gmra.mrb[0].mxu1 %vm204_vm0, %v411_v17 }
   0xf   :  { %356 = vmatpush3.bf16.msra.mxu0 %v396_v7 }
  0x10   :  { %357 = vmatprep.subr.bf16.mxu0 %v397_v8 }
  0x13   :  { %358 = vmatpush3.bf16.msra.mxu0 %v398_v9 }
  0x14   :  { %359 = vmatprep.subr.bf16.mxu0 %v399_v11 }
  0x17   :  { %360 = vmatpush3.bf16.msra.mxu0 %v400_v12 }
  0x18   :  { %361 = vmatprep.subr.bf16.mxu0 %v401_v13 }
  0x1b   :  { %362 = vmatpush3.bf16.msra.mxu0 %v402_v18 }
  0x1c   :  { %363 = vmatprep.subr.bf16.mxu0 %v403_v19 }
  0x1f   :  { %364 = vmatpush3.bf16.msra.mxu0 %v405_v20 }
  0x22   :  { %244 = vmatmul.mubr.bf16.vlgmr.msra.gmra.mrb[0].mxu0 %v406_v21 }
  0x23   :  { %251 = vmatprep.mubr.bf16.mxu0 %v412_v22 }
  0x2a   :  { %252 = vmatmul.mubr.bf16.gmra.mrb[4].mxu0 %v414_v23 }
  0xe1   :  { %v387_v24 = vpop.f32.mrb[0].mxu1 }
  0xe2   :  { %v294_v25 = vpop.f32.mrb[1].mxu1 }
  0xe3   :  { %v388_v26 = vpop.f32.mrb[2].mxu1 }
  0xe4   :  { %v297_v27 = vpop.f32.mrb[3].mxu1 }
  0xf5   :  { %v365_v28 = vpop.f32.mrb[0].mxu0 }
  0xf6   :  { %v366_v29 = vpop.f32.mrb[1].mxu0 }
  0xf7   :  { %v367_v31 = vadd.f32 %v366_v29, %v365_v28  ;;  %v368_v32 = vpop.f32.mrb[2].mxu0 }
  0xf8   :  { %v369_v33 = vpop.f32.mrb[3].mxu0 }
  0xf9   :  { %v370_v34 = vadd.f32 %v369_v33, %v368_v32  ;;  %v246_v35 = vadd.f32 %v367_v31, %v322_v30 }
  0xfb   :  { %v295_v36 = vadd.f32 %v294_v25, %v246_v35  ;;  %v249_v37 = vadd.f32 %v370_v34, %v322_v30 }
  0xfd   :  { %v309_v38 = vmax.f32 %v295_v36, 0.0  ;;  %v298_v39 = vadd.f32 %v297_v27, %v249_v37  ;;  %v371_v40 = vpop.f32.mrb[4].mxu0 }
  0xfe   :  { %v372_v41 = vpop.f32.mrb[5].mxu0 }
  0xff   :  { %314 = vst.msk [vmem:[%s529_s3] sm:$0xff] %vm313_vm1, %v309_v38  ;;  %v310_v42 = vmax.f32 %v298_v39, 0.0  ;;  %v373_v43 = vadd.f32 %v372_v41, %v371_v40  ;;  %v374_v44 = vpop.f32.mrb[6].mxu0 }
 0x100   :  { %v375_v45 = vpop.f32.mrb[7].mxu0 }
 0x101   :  { %315 = vst.msk [vmem:[%s529_s3 + $0x8] sm:$0xff] %vm313_vm1, %v310_v42  ;;  %v254_v46 = vadd.f32 %v373_v43, %v322_v30  ;;  %v376_v47 = vadd.f32 %v375_v45, %v374_v44 }
 0x103   :  { %v303_v48 = vadd.f32 %v387_v24, %v254_v46  ;;  %v257_v49 = vadd.f32 %v376_v47, %v322_v30 }
 0x105   :  { %v311_v50 = vmax.f32 %v303_v48, 0.0  ;;  %v306_v51 = vadd.f32 %v388_v26, %v257_v49 }
 0x107   :  { %316 = vst.msk [vmem:[%s529_s3 + $0x10] sm:$0xff] %vm313_vm1, %v311_v50  ;;  %v312_v52 = vmax.f32 %v306_v51, 0.0 }
 0x109   :  { %317 = vst.msk [vmem:[%s529_s3 + $0x18] sm:$0xff] %vm313_vm1, %v312_v52 }

// kernel: scnet_forward.20
= control target key start
LH: loop header
LB: loop body
LE: loop exit
PB: predicated region body
PF: predicated region fallthrough
CT: control target
= control target key end

     0   :  { %v175_v0 = vmov 0   ;;  %vm101_vm0 = vcmask 130048   ;;  %s234_s1 = inlined_call_operand.vmem [shape: bf16[144,16], index: 1, kind: input, shape index: {}]   ;;  %s235_s0 = inlined_call_operand.vmem [shape: bf16[8,144], index: 0, kind: input, shape index: {}]   ;;  %s236_s2 = inlined_call_operand.vmem [shape: f32[1,16], index: 2, kind: input, shape index: {}]   ;;  %s237_s3 = inlined_call_operand.vmem [shape: f32[8,16], index: 3, kind: output, shape index: {}]  }
   0x1   :  { %105 = vmatprep.subr.bf16.mxu0 %v175_v0  ;;  %v164_v1 = vld [vmem:[%s234_s1] sm:$0xff]   ;;  %v165_v2 = vld [vmem:[%s234_s1 + $0x8] sm:$0xff]   ;;  %v166_v3 = vld [vmem:[%s234_s1 + $0x10] sm:$0xff]  }
   0x2   :  { %106 = vmatpush1.bf16.msra.mxu0 %v164_v1  ;;  %v15_v4 = vld [vmem:[%s235_s0] sm:$0xff]  ;;  %v167_v5 = vld [vmem:[%s234_s1 + $0x18] sm:$0xff]   ;;  %v169_v8 = vld [vmem:[%s234_s1 + $0x28] sm:$0xff]  }
   0x3   :  { %107 = vmatprep.subr.bf16.mxu0 %v175_v0  ;;  %v152_v6 = vcombine.high %v15_v4, %v15_v4  ;;  %v168_v7 = vld [vmem:[%s234_s1 + $0x20] sm:$0xff]   ;;  %v170_v9 = vld [vmem:[%s234_s1 + $0x30] sm:$0xff]   ;;  %v171_v10 = vld [vmem:[%s234_s1 + $0x38] sm:$0xff]   ;;  %v151_v12 = vcombine.low %v15_v4, %v15_v4 }
   0x4   :  { %v172_v11 = vld [vmem:[%s234_s1 + $0x40] sm:$0xff]  }
   0x5   :  { %162 = vmatprep.mubr.msk.bf16.mxu0 %vm101_vm0, %v152_v6  ;;  %v150_v13 = vld [vmem:[%s236_s2] ss:$0 sm:$0xff] }
   0x6   :  { %108 = vmatpush1.bf16.msra.mxu0 %v165_v2 }
   0x7   :  { %109 = vmatprep.subr.bf16.mxu0 %v175_v0 }
   0xa   :  { %110 = vmatpush1.bf16.msra.mxu0 %v166_v3 }
   0xb   :  { %111 = vmatprep.subr.bf16.mxu0 %v175_v0 }
   0xe   :  { %112 = vmatpush1.bf16.msra.mxu0 %v167_v5 }
   0xf   :  { %113 = vmatprep.subr.bf16.mxu0 %v175_v0 }
  0x12   :  { %114 = vmatpush1.bf16.msra.mxu0 %v168_v7 }
  0x13   :  { %115 = vmatprep.subr.bf16.mxu0 %v175_v0 }
  0x16   :  { %116 = vmatpush1.bf16.msra.mxu0 %v169_v8 }
  0x17   :  { %117 = vmatprep.subr.bf16.mxu0 %v175_v0 }
  0x1a   :  { %118 = vmatpush1.bf16.msra.mxu0 %v170_v9 }
  0x1b   :  { %119 = vmatprep.subr.bf16.mxu0 %v175_v0 }
  0x1e   :  { %120 = vmatpush1.bf16.msra.mxu0 %v171_v10 }
  0x1f   :  { %121 = vmatprep.subr.bf16.mxu0 %v175_v0 }
  0x22   :  { %122 = vmatpush1.bf16.msra.mxu0 %v172_v11 }
  0x25   :  { %138 = vmatmul.mubr.bf16.vlgmr.msra.gmra.mrb[0].mxu0 %v151_v12 }
  0xf8   :  { %v139_v14 = vpop.f32.mrb[0].mxu0 }
  0xf9   :  { %v140_v15 = vadd.f32 %v150_v13, %v139_v14  ;;  %v141_v16 = vpop.f32.mrb[1].mxu0 }
  0xfa   :  { %v142_v17 = vpop.f32.mrb[2].mxu0 }
  0xfb   :  { %145 = vst.msk [vmem:[%s237_s3] sm:$0xff] %vm101_vm0, %v140_v15  ;;  %v143_v18 = vpop.f32.mrb[3].mxu0 }

// kernel: scnet_forward.22
= control target key start
LH: loop header
LB: loop body
LE: loop exit
PB: predicated region body
PF: predicated region fallthrough
CT: control target
= control target key end

     0   :  { %v234_v0 = vmov 0   ;;  %vm116_vm0 = vcmask 130048   ;;  %s315_s1 = inlined_call_operand.vmem [shape: bf16[144,16], index: 1, kind: input, shape index: {}]   ;;  %s316_s0 = inlined_call_operand.vmem [shape: bf16[32,144], index: 0, kind: input, shape index: {}]   ;;  %s317_s2 = inlined_call_operand.vmem [shape: f32[1,16], index: 2, kind: input, shape index: {}]   ;;  %s318_s3 = inlined_call_operand.vmem [shape: f32[32,16], index: 3, kind: output, shape index: {}]  }
   0x1   :  { %123 = vmatprep.subr.bf16.mxu0 %v234_v0  ;;  %200 = vmatprep.subr.bf16.mxu1 %v234_v0  ;;  %v219_v1 = vld [vmem:[%s315_s1] sm:$0xff]   ;;  %v220_v2 = vld [vmem:[%s315_s1 + $0x8] sm:$0xff]   ;;  %v221_v3 = vld [vmem:[%s315_s1 + $0x10] sm:$0xff]  }
   0x2   :  { %124 = vmatpush1.bf16.msra.mxu0 %v219_v1  ;;  %209 = vmatpush1.bf16.msra.mxu1 %v219_v1  ;;  %v222_v4 = vld [vmem:[%s315_s1 + $0x18] sm:$0xff]   ;;  %v230_v5 = vld [vmem:[%s316_s0 + $0x4] ss:$8 sps:$4 sm:$0xff]   ;;  %v225_v9 = vld [vmem:[%s315_s1 + $0x30] sm:$0xff]  }
   0x3   :  { %125 = vmatprep.subr.bf16.mxu0 %v234_v0  ;;  %201 = vmatprep.subr.bf16.mxu1 %v234_v0  ;;  %v233_v6 = vld [vmem:[%s316_s0 + $0x14] ss:$8 sps:$4 sm:$0xff]   ;;  %v223_v7 = vld [vmem:[%s315_s1 + $0x20] sm:$0xff]   ;;  %v224_v8 = vld [vmem:[%s315_s1 + $0x28] sm:$0xff]  }
   0x4   :  { %198 = vmatprep.mubr.msk.bf16.mxu0 %vm116_vm0, %v230_v5  ;;  %199 = vmatprep.mubr.msk.bf16.mxu1 %vm116_vm0, %v233_v6  ;;  %v226_v10 = vld [vmem:[%s315_s1 + $0x38] sm:$0xff]   ;;  %v227_v11 = vld [vmem:[%s315_s1 + $0x40] sm:$0xff]  }
   0x5   :  { %v228_v12 = vld [vmem:[%s316_s0] ss:$8 sps:$4 sm:$0xff]   ;;  %v231_v13 = vld [vmem:[%s316_s0 + $0x10] ss:$8 sps:$4 sm:$0xff]  }
   0x6   :  { %126 = vmatpush1.bf16.msra.mxu0 %v220_v2  ;;  %210 = vmatpush1.bf16.msra.mxu1 %v220_v2  ;;  %v184_v14 = vld [vmem:[%s317_s2] ss:$0 sm:$0xff] }
   0x7   :  { %127 = vmatprep.subr.bf16.mxu0 %v234_v0  ;;  %202 = vmatprep.subr.bf16.mxu1 %v234_v0 }
   0xa   :  { %128 = vmatpush1.bf16.msra.mxu0 %v221_v3  ;;  %211 = vmatpush1.bf16.msra.mxu1 %v221_v3 }
   0xb   :  { %129 = vmatprep.subr.bf16.mxu0 %v234_v0  ;;  %203 = vmatprep.subr.bf16.mxu1 %v234_v0 }
   0xe   :  { %130 = vmatpush1.bf16.msra.mxu0 %v222_v4  ;;  %212 = vmatpush1.bf16.msra.mxu1 %v222_v4 }
   0xf   :  { %131 = vmatprep.subr.bf16.mxu0 %v234_v0  ;;  %204 = vmatprep.subr.bf16.mxu1 %v234_v0 }
  0x12   :  { %132 = vmatpush1.bf16.msra.mxu0 %v223_v7  ;;  %213 = vmatpush1.bf16.msra.mxu1 %v223_v7 }
  0x13   :  { %133 = vmatprep.subr.bf16.mxu0 %v234_v0  ;;  %205 = vmatprep.subr.bf16.mxu1 %v234_v0 }
  0x16   :  { %134 = vmatpush1.bf16.msra.mxu0 %v224_v8  ;;  %214 = vmatpush1.bf16.msra.mxu1 %v224_v8 }
  0x17   :  { %135 = vmatprep.subr.bf16.mxu0 %v234_v0  ;;  %206 = vmatprep.subr.bf16.mxu1 %v234_v0 }
  0x1a   :  { %136 = vmatpush1.bf16.msra.mxu0 %v225_v9  ;;  %215 = vmatpush1.bf16.msra.mxu1 %v225_v9 }
  0x1b   :  { %137 = vmatprep.subr.bf16.mxu0 %v234_v0  ;;  %207 = vmatprep.subr.bf16.mxu1 %v234_v0 }
  0x1e   :  { %138 = vmatpush1.bf16.msra.mxu0 %v226_v10  ;;  %216 = vmatpush1.bf16.msra.mxu1 %v226_v10 }
  0x1f   :  { %139 = vmatprep.subr.bf16.mxu0 %v234_v0  ;;  %208 = vmatprep.subr.bf16.mxu1 %v234_v0 }
  0x22   :  { %140 = vmatpush1.bf16.msra.mxu0 %v227_v11  ;;  %217 = vmatpush1.bf16.msra.mxu1 %v227_v11 }
  0x25   :  { %156 = vmatmul.mubr.bf16.vlgmr.msra.gmra.mrb[0].mxu0 %v228_v12  ;;  %164 = vmatmul.mubr.bf16.vlgmr.msra.gmra.mrb[0].mxu1 %v231_v13 }
  0xf8   :  { %v157_v15 = vpop.f32.mrb[0].mxu0  ;;  %v165_v16 = vpop.f32.mrb[0].mxu1 }
  0xf9   :  { %v158_v17 = vadd.f32 %v184_v14, %v157_v15  ;;  %v166_v18 = vadd.f32 %v184_v14, %v165_v16  ;;  %v159_v19 = vpop.f32.mrb[1].mxu0  ;;  %v167_v20 = vpop.f32.mrb[1].mxu1 }
  0xfa   :  { %v160_v21 = vpop.f32.mrb[2].mxu0  ;;  %v168_v22 = vpop.f32.mrb[2].mxu1 }
  0xfb   :  { %v172_v23 = vmax.f32 %v158_v17, 0.0  ;;  %v174_v24 = vmax.f32 %v166_v18, 0.0  ;;  %v161_v25 = vadd.f32 %v184_v14, %v160_v21  ;;  %v169_v26 = vadd.f32 %v184_v14, %v168_v22  ;;  %v162_v27 = vpop.f32.mrb[3].mxu0  ;;  %v170_v28 = vpop.f32.mrb[3].mxu1 }
  0xfd   :  { %176 = vst.msk [vmem:[%s318_s3] sm:$0xff] %vm116_vm0, %v172_v23  ;;  %178 = vst.msk [vmem:[%s318_s3 + $0x10] sm:$0xff] %vm116_vm0, %v174_v24  ;;  %v173_v29 = vmax.f32 %v161_v25, 0.0  ;;  %v175_v30 = vmax.f32 %v169_v26, 0.0 }
  0xff   :  { %177 = vst.msk [vmem:[%s318_s3 + $0x8] sm:$0xff] %vm116_vm0, %v173_v29  ;;  %179 = vst.msk [vmem:[%s318_s3 + $0x18] sm:$0xff] %vm116_vm0, %v175_v30 }

// kernel: scnet_forward.21
= control target key start
LH: loop header
LB: loop body
LE: loop exit
PB: predicated region body
PF: predicated region fallthrough
CT: control target
= control target key end

     0   :  { %v288_v0 = vmov 0   ;;  %vm122_vm0 = vcmask 130048   ;;  %s403_s1 = inlined_call_operand.vmem [shape: bf16[144,16], index: 1, kind: input, shape index: {}]   ;;  %s404_s0 = inlined_call_operand.vmem [shape: bf16[32,144], index: 0, kind: input, shape index: {}]   ;;  %s405_s3 = inlined_call_operand.vmem [shape: f32[32,16], index: 3, kind: input, shape index: {}]   ;;  %s406_s4 = inlined_call_operand.vmem [shape: f32[32,16], index: 4, kind: input, shape index: {}]   ;;  %s407_s2 = inlined_call_operand.vmem [shape: f32[1,16], index: 2, kind: input, shape index: {}]   ;;  %s408_s5 = inlined_call_operand.vmem [shape: f32[32,16], index: 5, kind: output, shape index: {}]  }
   0x1   :  { %129 = vmatprep.subr.bf16.mxu0 %v288_v0  ;;  %238 = vmatprep.subr.bf16.mxu1 %v288_v0  ;;  %v257_v1 = vld [vmem:[%s403_s1] sm:$0xff]   ;;  %v258_v2 = vld [vmem:[%s403_s1 + $0x8] sm:$0xff]   ;;  %v259_v3 = vld [vmem:[%s403_s1 + $0x10] sm:$0xff]  }
   0x2   :  { %130 = vmatpush1.bf16.msra.mxu0 %v257_v1  ;;  %247 = vmatpush1.bf16.msra.mxu1 %v257_v1  ;;  %v260_v4 = vld [vmem:[%s403_s1 + $0x18] sm:$0xff]   ;;  %v268_v5 = vld [vmem:[%s404_s0 + $0x4] ss:$8 sps:$4 sm:$0xff]   ;;  %v263_v9 = vld [vmem:[%s403_s1 + $0x30] sm:$0xff]  }
   0x3   :  { %131 = vmatprep.subr.bf16.mxu0 %v288_v0  ;;  %239 = vmatprep.subr.bf16.mxu1 %v288_v0  ;;  %v271_v6 = vld [vmem:[%s404_s0 + $0x14] ss:$8 sps:$4 sm:$0xff]   ;;  %v261_v7 = vld [vmem:[%s403_s1 + $0x20] sm:$0xff]   ;;  %v262_v8 = vld [vmem:[%s403_s1 + $0x28] sm:$0xff]  }
   0x4   :  { %236 = vmatprep.mubr.msk.bf16.mxu0 %vm122_vm0, %v268_v5  ;;  %237 = vmatprep.mubr.msk.bf16.mxu1 %vm122_vm0, %v271_v6  ;;  %v264_v10 = vld [vmem:[%s403_s1 + $0x38] sm:$0xff]   ;;  %v265_v11 = vld [vmem:[%s403_s1 + $0x40] sm:$0xff]   ;;  %v180_v16 = vld [vmem:[%s405_s3 + $0x10] sm:$0xff] }
   0x5   :  { %v266_v12 = vld [vmem:[%s404_s0] ss:$8 sps:$4 sm:$0xff]   ;;  %v269_v13 = vld [vmem:[%s404_s0 + $0x10] ss:$8 sps:$4 sm:$0xff]  }
   0x6   :  { %132 = vmatpush1.bf16.msra.mxu0 %v258_v2  ;;  %248 = vmatpush1.bf16.msra.mxu1 %v258_v2  ;;  %v178_v14 = vld [vmem:[%s405_s3] sm:$0xff]  ;;  %v184_v17 = vld [vmem:[%s406_s4 + $0x10] sm:$0xff]  ;;  %v179_v18 = vld [vmem:[%s405_s3 + $0x8] sm:$0xff] }
   0x7   :  { %133 = vmatprep.subr.bf16.mxu0 %v288_v0  ;;  %240 = vmatprep.subr.bf16.mxu1 %v288_v0  ;;  %v182_v15 = vld [vmem:[%s406_s4] sm:$0xff]  ;;  %v183_v19 = vld [vmem:[%s406_s4 + $0x8] sm:$0xff]  ;;  %v181_v21 = vld [vmem:[%s405_s3 + $0x18] sm:$0xff]  ;;  %v188_v23 = vadd.f32 %v184_v17, %v180_v16 }
   0x8   :  { %v186_v20 = vadd.f32 %v182_v15, %v178_v14  ;;  %v185_v22 = vld [vmem:[%s406_s4 + $0x18] sm:$0xff]  ;;  %v187_v24 = vadd.f32 %v183_v19, %v179_v18  ;;  %v222_v42 = vld [vmem:[%s407_s2] ss:$0 sm:$0xff] }
   0x9   :  { %v189_v25 = vadd.f32 %v185_v22, %v181_v21  ;;  %v192_v27 = vsub.f32 0.0, %v188_v23 }
   0xa   :  { %134 = vmatpush1.bf16.msra.mxu0 %v259_v3  ;;  %249 = vmatpush1.bf16.msra.mxu1 %v259_v3  ;;  %v190_v26 = vsub.f32 0.0, %v186_v20  ;;  %v191_v28 = vsub.f32 0.0, %v187_v24 }
   0xb   :  { %135 = vmatprep.subr.bf16.mxu0 %v288_v0  ;;  %241 = vmatprep.subr.bf16.mxu1 %v288_v0  ;;  %v193_v29 = vsub.f32 0.0, %v189_v25  ;;  %v198_v31 = vmul.f32 1.442695, %v192_v27 }
   0xc   :  { %v194_v30 = vmul.f32 1.442695, %v190_v26  ;;  %v196_v32 = vmul.f32 1.442695, %v191_v28 }
   0xd   :  { %v200_v33 = vmul.f32 1.442695, %v193_v29 }
   0xe   :  { %136 = vmatpush1.bf16.msra.mxu0 %v260_v4  ;;  %250 = vmatpush1.bf16.msra.mxu1 %v260_v4  ;;  %272 = vpow2.f32 %v194_v30 }
   0xf   :  { %137 = vmatprep.subr.bf16.mxu0 %v288_v0  ;;  %242 = vmatprep.subr.bf16.mxu1 %v288_v0  ;;  %274 = vpow2.f32 %v198_v31 }
  0x10   :  { %276 = vpow2.f32 %v196_v32 }
  0x11   :  { %278 = vpow2.f32 %v200_v33 }
  0x12   :  { %138 = vmatpush1.bf16.msra.mxu0 %v261_v7  ;;  %251 = vmatpush1.bf16.msra.mxu1 %v261_v7 }
  0x13   :  { %139 = vmatprep.subr.bf16.mxu0 %v288_v0  ;;  %243 = vmatprep.subr.bf16.mxu1 %v288_v0 }
  0x16   :  { %140 = vmatpush1.bf16.msra.mxu0 %v262_v8  ;;  %252 = vmatpush1.bf16.msra.mxu1 %v262_v8 }
  0x17   :  { %141 = vmatprep.subr.bf16.mxu0 %v288_v0  ;;  %244 = vmatprep.subr.bf16.mxu1 %v288_v0 }
  0x18   :  { %v273_v34 = vpop.eup %272 }
  0x19   :  { %v275_v35 = vpop.eup %274  ;;  %v202_v38 = vadd.f32 1.0, %v273_v34 }
  0x1a   :  { %142 = vmatpush1.bf16.msra.mxu0 %v263_v9  ;;  %253 = vmatpush1.bf16.msra.mxu1 %v263_v9  ;;  %v277_v36 = vpop.eup %276  ;;  %v204_v39 = vadd.f32 1.0, %v275_v35 }
  0x1b   :  { %143 = vmatprep.subr.bf16.mxu0 %v288_v0  ;;  %245 = vmatprep.subr.bf16.mxu1 %v288_v0  ;;  %v279_v37 = vpop.eup %278  ;;  %v203_v40 = vadd.f32 1.0, %v277_v36  ;;  %280 = vrcp.f32 %v202_v38 }
  0x1c   :  { %v205_v41 = vadd.f32 1.0, %v279_v37  ;;  %282 = vrcp.f32 %v204_v39 }
  0x1d   :  { %284 = vrcp.f32 %v203_v40 }
  0x1e   :  { %144 = vmatpush1.bf16.msra.mxu0 %v264_v10  ;;  %254 = vmatpush1.bf16.msra.mxu1 %v264_v10  ;;  %286 = vrcp.f32 %v205_v41 }
  0x1f   :  { %145 = vmatprep.subr.bf16.mxu0 %v288_v0  ;;  %246 = vmatprep.subr.bf16.mxu1 %v288_v0 }
  0x22   :  { %146 = vmatpush1.bf16.msra.mxu0 %v265_v11  ;;  %255 = vmatpush1.bf16.msra.mxu1 %v265_v11 }
  0x25   :  { %162 = vmatmul.mubr.bf16.vlgmr.msra.gmra.mrb[0].mxu0 %v266_v12  ;;  %170 = vmatmul.mubr.bf16.vlgmr.msra.gmra.mrb[0].mxu1 %v269_v13  ;;  %v281_v43 = vpop.eup %280 }
  0x26   :  { %v283_v44 = vpop.eup %282 }
  0x27   :  { %v285_v47 = vpop.eup %284 }
  0x28   :  { %v287_v52 = vpop.eup %286 }
  0xf8   :  { %v163_v45 = vpop.f32.mrb[0].mxu0  ;;  %v171_v46 = vpop.f32.mrb[0].mxu1 }
  0xf9   :  { %v164_v48 = vadd.f32 %v222_v42, %v163_v45  ;;  %v172_v49 = vadd.f32 %v222_v42, %v171_v46  ;;  %v165_v50 = vpop.f32.mrb[1].mxu0  ;;  %v173_v51 = vpop.f32.mrb[1].mxu1 }
  0xfa   :  { %v166_v53 = vpop.f32.mrb[2].mxu0  ;;  %v174_v54 = vpop.f32.mrb[2].mxu1 }
  0xfb   :  { %v210_v55 = vmul.f32 %v281_v43, %v164_v48  ;;  %v212_v56 = vmul.f32 %v283_v44, %v172_v49  ;;  %v167_v57 = vadd.f32 %v222_v42, %v166_v53  ;;  %v175_v58 = vadd.f32 %v222_v42, %v174_v54  ;;  %v168_v59 = vpop.f32.mrb[3].mxu0  ;;  %v176_v60 = vpop.f32.mrb[3].mxu1 }
  0xfd   :  { %214 = vst.msk [vmem:[%s408_s5] sm:$0xff] %vm122_vm0, %v210_v55  ;;  %216 = vst.msk [vmem:[%s408_s5 + $0x10] sm:$0xff] %vm122_vm0, %v212_v56  ;;  %v211_v61 = vmul.f32 %v285_v47, %v167_v57  ;;  %v213_v62 = vmul.f32 %v287_v52, %v175_v58 }
  0xff   :  { %215 = vst.msk [vmem:[%s408_s5 + $0x8] sm:$0xff] %vm122_vm0, %v211_v61  ;;  %217 = vst.msk [vmem:[%s408_s5 + $0x18] sm:$0xff] %vm122_vm0, %v213_v62 }

// kernel: scnet_forward.23
= control target key start
LH: loop header
LB: loop body
LE: loop exit
PB: predicated region body
PF: predicated region fallthrough
CT: control target
= control target key end

     0   :  { %vm48_vm0 = vcmask 130048   ;;  %s246_s0 = inlined_call_operand.vmem [shape: bf16[32,16], index: 0, kind: input, shape index: {}]   ;;  %s247_s1 = inlined_call_operand.vmem [shape: bf16[16,64], index: 1, kind: input, shape index: {}]   ;;  %s248_s2 = inlined_call_operand.vmem [shape: f32[1,64], index: 2, kind: input, shape index: {}]   ;;  %s249_s3 = inlined_call_operand.vmem [shape: f32[32,64], index: 3, kind: input, shape index: {}]   ;;  %s250_s4 = inlined_call_operand.hbm [shape: f32[32,64], index: 4, kind: output, shape index: {}]  }
   0x1   :  { %v155_v0 = vld [vmem:[%s247_s1] sm:$0xff]   ;;  %v157_v2 = vld [vmem:[%s246_s0 + $0x8] sm:$0xff]  }
   0x2   :  { %v156_v1 = vld [vmem:[%s246_s0] sm:$0xff]   ;;  %146 = vmatprep.subr.bf16.mxu0 %v155_v0 }
   0x3   :  { %147 = vmatpush3.bf16.msra.mxu0 %v155_v0  ;;  %148 = vmatprep.mubr.msk.bf16.mxu0 %vm48_vm0, %v156_v1 }
   0x4   :  { %9 = vsyncpa [#allocation3], 0  ;;  %v137_v3 = vld [vmem:[%s248_s2] ss:$0 sm:$0xff]  ;;  %v106_v5 = vld [vmem:[%s249_s3 + $0x10] sm:$0xff]  ;;  %vm116_vm1 = vcmask 523264  }
   0x5   :  { %v104_v8 = vld [vmem:[%s249_s3] sm:$0xff]  ;;  %v107_v11 = vld [vmem:[%s249_s3 + $0x18] sm:$0xff]  ;;  %v105_v15 = vld [vmem:[%s249_s3 + $0x8] sm:$0xff]  ;;  %s182_s28 = smov [#allocation2]  }
   0x6   :  { %149 = vmatmul.mubr.msk.bf16.vlgmr.msra.gmra.mrb[0].mxu0 %vm48_vm0, %v157_v2  ;;  %s126_s29 = sshll.u32 %s182_s28, 4  ;;  %s127_s29 = int_to_ptr.vmem [resolvable:$true] %s126_s29 }
   0x7   :  { %s158_s30 = scalar_lea.vmem %s127_s29, 512  ;;  %p163_p1 = scmp.lt.s32.totalorder %s127_s29, %s127_s29 }
   0x8   :  { %p159_p0 = scmp.ne.s32.totalorder %s127_s29, %s158_s30  ;;  %p164_p2 = scmp.lt.s32.totalorder %s158_s30, %s158_s30 }
   0xa   :  { %p165_p3 = por %p164_p2, %p163_p1 }
   0xc   :  { %p166_p4 = pnand %p165_p3, %p159_p0 }
  0xd9   :  { %v150_v4 = vpop.f32.mrb[0].mxu0 }
  0xda   :  { %v98_v6 = vadd.f32 %v150_v4, %v137_v3  ;;  %v89_v7 = vpop.f32.mrb[1].mxu0 }
  0xdb   :  { %v90_v9 = vadd.f32 %v137_v3, %v89_v7  ;;  %v151_v10 = vpop.f32.mrb[2].mxu0 }
  0xdc   :  { %v110_v12 = vadd.f32 %v106_v5, %v98_v6  ;;  %v101_v13 = vadd.f32 %v151_v10, %v137_v3  ;;  %v92_v14 = vpop.f32.mrb[3].mxu0 }
  0xdd   :  { %v108_v16 = vadd.f32 %v104_v8, %v90_v9  ;;  %v93_v17 = vadd.f32 %v137_v3, %v92_v14 }
  0xde   :  { %v114_v18 = vmax.f32 %v110_v12, 0.0  ;;  %v111_v19 = vadd.f32 %v107_v11, %v101_v13 }
  0xdf   :  { %v112_v20 = vmax.f32 %v108_v16, 0.0  ;;  %v109_v21 = vadd.f32 %v105_v15, %v93_v17 }
  0xe0   :  { %119 = vst.msk [vmem:[#allocation2 + $0x10] sm:$0xff] %vm116_vm1, %v114_v18  ;;  %v115_v22 = vmax.f32 %v111_v19, 0.0 }
  0xe1   :  { %117 = vst.msk [vmem:[#allocation2] sm:$0xff] %vm116_vm1, %v112_v20  ;;  %v113_v23 = vmax.f32 %v109_v21, 0.0 }
  0xe2   :  { %120 = vst.msk [vmem:[#allocation2 + $0x18] sm:$0xff] %vm116_vm1, %v115_v22 }
  0xe3   :  { %118 = vst.msk [vmem:[#allocation2 + $0x8] sm:$0xff] %vm116_vm1, %v113_v23 }
  0xe4   :  { %169 = shalt.err (!%p166_p4)
}
  0xe5   :  { %s170_s6 = scalar_lea.hbm %s250_s4, 512 }
  0xe6   :  { %p171_p5 = scmp.ne.s32.totalorder %s250_s4, %s170_s6  ;;  %p174_p6 = scmp.lt.u32.totalorder %s170_s6, %s250_s4 }
  0xe8   :  { %p176_p7 = pnand %p174_p6, %p171_p5 }
  0xea   :  { %179 = shalt.err (!%p176_p7)
}
  0xeb   :  { %s183_s11 = smov 128   ;;  %s184_s12 = smov 8  }
  0xec   :  { %132 = dma.vmem_to_hbm [thread:$0]  %s127_s29, 512, %s250_s4, [#allocation3], %s183_s11, %s183_s11, %s184_s12  }
  0xed   :  { %180 = dma.done.wait [#allocation3], 512  }
  0xee   :  { %181 = vsyncadd [#allocation3], 4294966784 }
  0xef   :  { %136 = vsyncpa [#allocation3], 1 }

</bundles_post_ra>
